<compile_context>
chip_gen: v5e
topology: v5e:2x2
jax: 0.10.0
libtpu: 0.0.40
codegen_flags: <defaults>
</compile_context>

<pallas_src>
import functools

import jax
import jax.numpy as jnp
from jax import lax
from jax.experimental import pallas as pl
from jax.experimental.pallas import tpu as pltpu

EPS = 1e-5  # BatchNorm eps (torch default)


# ----------------------------- Pallas kernel ---------------------------------

def _eegnet_fused_kernel(x_ref, a1_ref, c1_ref, a2_ref, c2_ref, a3_ref, c3_ref,
                         o_ref):
    """Whole EEGNet forward for one batch row-block: 3 bf16 matmuls + 2 ELUs."""
    # matmul 1: (BB, C*T) @ (C*T, F2*T)  -> f32 accum
    z = jnp.dot(x_ref[...], a1_ref[...],
                preferred_element_type=jnp.float32) + c1_ref[...]
    h = jnp.where(z > 0, z, jnp.exp(z) - 1.0)                # ELU(alpha=1), f32
    # matmul 2: (BB, F2*T) @ (F2*T, F2*T1)
    z = jnp.dot(h.astype(jnp.bfloat16), a2_ref[...],
                preferred_element_type=jnp.float32) + c2_ref[...]
    h = jnp.where(z > 0, z, jnp.exp(z) - 1.0)
    # matmul 3: (BB, F2*T1) @ (F2*T1, 128 padded classes)  -> lane-dense store
    o_ref[...] = (jnp.dot(h.astype(jnp.bfloat16), a3_ref[...],
                          preferred_element_type=jnp.float32) + c3_ref[...])


# ----------------------------- glue helpers ----------------------------------

def _bn_scale_shift(gamma, beta, mean, var):
    scale = gamma / jnp.sqrt(var + EPS)
    return scale, beta - mean * scale


def _same_pad(k):
    # compute_same_pad2d for stride 1 (TF-style: extra padding on the right)
    total = k - 1
    return total // 2, total - total // 2


def _round_up(n, m):
    return (n + m - 1) // m * m


def _batch_blocking(b):
    """Return (padded_batch, row_block).

    Row-blocks are multiples of 16 (bf16 sublane packing).  Small batches use
    a single large block (grid overhead ~0.35us/step); batches >= 256 are split
    into >= 2 blocks so the "parallel" grid axis can shard across v7x's two
    TensorCores (on v5e/v6e the extra step is negligible).
    """
    if b < 256:
        bb = max(16, _round_up(b, 16))
        return bb, bb
    bb = 256 if b >= 1024 else 128
    return _round_up(b, bb), bb


def _fold_params(p, cfg):
    """Fold the whole eval-mode network into 3 dense matrices + 3 bias rows.

    Depends only on the parameters; under jit this is hoisted out of the
    per-example path.  Matrices are returned in bfloat16 (MXU-native), bias
    rows in float32.
    """
    C, T = cfg["n_channels"], cfg["n_samples"]
    F1, D, K1 = cfg["F1"], cfg["D"], cfg["K1"]
    F2, K2 = cfg["F2"], cfg["K2"]
    P1, P2 = cfg["pool1"], cfg["pool2"]
    n_classes = cfg["n_classes"]
    T1, T2 = T // P1, T // (P1 * P2)
    l1, _ = _same_pad(K1)
    l3, _ = _same_pad(K2)
    NCP = _round_up(n_classes, 128)          # lane-dense padded class axis

    s1, sh1 = _bn_scale_shift(p["bn1_gamma"], p["bn1_beta"], p["bn1_mean"], p["bn1_var"])
    s2, sh2 = _bn_scale_shift(p["bn2_gamma"], p["bn2_beta"], p["bn2_mean"], p["bn2_var"])
    s3, sh3 = _bn_scale_shift(p["bn3_gamma"], p["bn3_beta"], p["bn3_mean"], p["bn3_var"])

    f_of_o = jnp.arange(F2) // D             # grouped-conv channel map (o -> f)

    # ---- A1 / c1 : time-conv (same-pad folded into band) + BN1 + depthwise + BN2
    # A1[c*T + ti, o*T + t] = s2[o]*s1[f(o)]*w_depth[o,c]*w_time[f(o), ti - t + l1]
    ti = jnp.arange(T)
    t = jnp.arange(T)
    k = ti[:, None] - t[None, :] + l1                               # (T, T)
    valid = (k >= 0) & (k < K1)
    wt_band = jnp.where(valid[None], p["w_time"][:, jnp.clip(k, 0, K1 - 1)], 0.0)  # (F1,T,T)
    band_o = wt_band[f_of_o]                                        # (F2, T, T)
    coef_oc = p["w_depth"] * (s2 * s1[f_of_o])[:, None]             # (F2, C)
    A1 = jnp.einsum("oc,oit->ciot", coef_oc, band_o).reshape(C * T, F2 * T)
    c1 = s2 * sh1[f_of_o] * p["w_depth"].sum(axis=1) + sh2          # (F2,)
    c1_row = jnp.repeat(c1, T)[None, :]                             # (1, F2*T)

    # ---- A2 / c2 : AvgPool(1,P1) + depthwise (1,K2) + pointwise 1x1 + BN3 ---
    # A2[o*T + t, m*T1 + t1] = s3[m]*w_sep_point[m,o]*(1/P1)*w_sep_depth[o, t//P1 - t1 + l3]
    t = jnp.arange(T)
    t1 = jnp.arange(T1)
    kk = (t[:, None] // P1) - t1[None, :] + l3                      # (T, T1)
    valid2 = (kk >= 0) & (kk < K2)
    wsd_band = jnp.where(valid2[None],
                         p["w_sep_depth"][:, jnp.clip(kk, 0, K2 - 1)], 0.0) / P1   # (F2,T,T1)
    coef_mo = p["w_sep_point"] * s3[:, None]                        # (F2_m, F2_o)
    A2 = jnp.einsum("mo,otu->otmu", coef_mo, wsd_band).reshape(F2 * T, F2 * T1)
    c2_row = jnp.repeat(sh3, T1)[None, :]                           # (1, F2*T1)

    # ---- A3 / c3 : AvgPool(1,P2) + Flatten + Linear(M, n_classes), padded to 128
    # A3[m*T1 + t1, n] = w_fc[n, m*T2 + t1//P2] / P2
    idx = jnp.arange(F2 * T1)
    m_idx, t1_idx = idx // T1, idx % T1
    col = m_idx * T2 + t1_idx // P2
    A3 = p["w_fc"][:, col].T / P2                                   # (F2*T1, n_classes)
    A3 = jnp.pad(A3, ((0, 0), (0, NCP - n_classes)))                # zero columns -> lane dense
    c3_row = jnp.pad(p["b_fc"], (0, NCP - n_classes))[None, :]      # (1, NCP)

    A1 = A1.astype(jnp.bfloat16)
    A2 = A2.astype(jnp.bfloat16)
    A3 = A3.astype(jnp.bfloat16)

    meta = dict(T=T, T1=T1, C=C, F2=F2, n_classes=n_classes, NCP=NCP)
    return (A1, c1_row.astype(jnp.float32), A2, c2_row.astype(jnp.float32),
            A3, c3_row.astype(jnp.float32)), meta


# ----------------------------- forward ----------------------------------------

def eegnet_forward(x, p, cfg):
    B = x.shape[0]
    (A1, c1, A2, c2, A3, c3), meta = _fold_params(p, cfg)
    C, T, T1 = meta["C"], meta["T"], meta["T1"]
    F2, n_classes, NCP = meta["F2"], meta["n_classes"], meta["NCP"]
    K0 = C * T                                                      # matmul-1 K (unpadded)

    # flatten (no zero-padding of the time axis needed any more) & cast to bf16
    x_flat = x.reshape(B, K0).astype(jnp.bfloat16)                  # (B, C*T)

    B_pad, BB = _batch_blocking(B)
    if B_pad != B:
        x_flat = jnp.pad(x_flat, ((0, B_pad - B), (0, 0)))
    nb = B_pad // BB

    N1, N2 = F2 * T, F2 * T1
    cost = pl.CostEstimate(
        flops=int(2 * B_pad * (K0 * N1 + N1 * N2 + N2 * NCP)),
        transcendentals=int(B_pad * (N1 + N2)),
        bytes_accessed=int(2 * (x_flat.size + A1.size + A2.size + A3.size)
                           + 4 * (c1.size + c2.size + c3.size)
                           + 4 * B_pad * NCP),
    )

    out = pl.pallas_call(
        _eegnet_fused_kernel,
        out_shape=jax.ShapeDtypeStruct((B_pad, NCP), jnp.float32),
        grid=(nb,),
        in_specs=[
            pl.BlockSpec((BB, K0), lambda i: (i, 0)),
            # weights / biases: constant index_map -> DMA'd once, reused per block
            pl.BlockSpec((K0, N1), lambda i: (0, 0)),
            pl.BlockSpec((1, N1), lambda i: (0, 0)),
            pl.BlockSpec((N1, N2), lambda i: (0, 0)),
            pl.BlockSpec((1, N2), lambda i: (0, 0)),
            pl.BlockSpec((N2, NCP), lambda i: (0, 0)),
            pl.BlockSpec((1, NCP), lambda i: (0, 0)),
        ],
        out_specs=pl.BlockSpec((BB, NCP), lambda i: (i, 0)),
        compiler_params=pltpu.CompilerParams(
            dimension_semantics=("parallel",),
            vmem_limit_bytes=64 * 1024 * 1024),
        cost_estimate=cost,
    )(x_flat, A1, c1, A2, c2, A3, c3)
    return out[:B, :n_classes]


# ----------------------------- params & reference -----------------------------

def init_params(key, cfg):
    C, T = cfg["n_channels"], cfg["n_samples"]
    F1, K1, F2, K2 = cfg["F1"], cfg["K1"], cfg["F2"], cfg["K2"]
    n_classes = cfg["n_classes"]
    M = F2 * (T // (cfg["pool1"] * cfg["pool2"]))
    ks = jax.random.split(key, 5)

    def xavier(k, shape, fan_in, fan_out):
        a = (6.0 / (fan_in + fan_out)) ** 0.5
        return jax.random.uniform(k, shape, jnp.float32, -a, a)

    p = {
        "w_time": xavier(ks[0], (F1, K1), K1, F1 * K1),        # Conv2d(1,F1,(1,K1))
        "w_depth": xavier(ks[1], (F2, C), C, F2 * C),          # Conv2d(F1,F2,(C,1),groups=F1)
        "w_sep_depth": xavier(ks[2], (F2, K2), K2, F2 * K2),   # depthwise (1,K2)
        "w_sep_point": xavier(ks[3], (F2, F2), F2, F2),        # pointwise 1x1
        "w_fc": xavier(ks[4], (n_classes, M), M, n_classes),   # Linear(M, n_classes)
        "b_fc": jnp.zeros((n_classes,), jnp.float32),
    }
    for i, nfeat in ((1, F1), (2, F2), (3, F2)):
        p[f"bn{i}_gamma"] = jnp.ones((nfeat,), jnp.float32)
        p[f"bn{i}_beta"] = jnp.zeros((nfeat,), jnp.float32)
        p[f"bn{i}_mean"] = jnp.zeros((nfeat,), jnp.float32)
        p[f"bn{i}_var"] = jnp.ones((nfeat,), jnp.float32)
    return p


def reference_forward(x, p, cfg):
    """Independent pure-JAX (NCHW) reference mirroring the PyTorch eval forward."""
    hp = lax.Precision.HIGHEST
    B = x.shape[0]
    C, T = cfg["n_channels"], cfg["n_samples"]
    F1, K1, F2, K2 = cfg["F1"], cfg["K1"], cfg["F2"], cfg["K2"]
    P1, P2 = cfg["pool1"], cfg["pool2"]
    dn = ("NCHW", "OIHW", "NCHW")

    def bn(y, g, bta, m, v):
        s = g / jnp.sqrt(v + EPS)
        return y * s.reshape(1, -1, 1, 1) + (bta - m * s).reshape(1, -1, 1, 1)

    def elu(y):
        return jnp.where(y > 0, y, jnp.expm1(y))

    x4 = x[:, None, :, :]
    l1, r1 = _same_pad(K1)
    x4 = jnp.pad(x4, ((0, 0), (0, 0), (0, 0), (l1, r1)))
    y = lax.conv_general_dilated(x4, p["w_time"].reshape(F1, 1, 1, K1), (1, 1), "VALID",
                                 dimension_numbers=dn, precision=hp)
    y = bn(y, p["bn1_gamma"], p["bn1_beta"], p["bn1_mean"], p["bn1_var"])

    y = lax.conv_general_dilated(y, p["w_depth"].reshape(F2, 1, C, 1), (1, 1), "VALID",
                                 dimension_numbers=dn, feature_group_count=F1, precision=hp)
    y = bn(y, p["bn2_gamma"], p["bn2_beta"], p["bn2_mean"], p["bn2_var"])
    y = elu(y)
    y = y.reshape(B, F2, 1, T // P1, P1).mean(-1)

    l3, r3 = _same_pad(K2)
    y = jnp.pad(y, ((0, 0), (0, 0), (0, 0), (l3, r3)))
    y = lax.conv_general_dilated(y, p["w_sep_depth"].reshape(F2, 1, 1, K2), (1, 1), "VALID",
                                 dimension_numbers=dn, feature_group_count=F2, precision=hp)
    y = lax.conv_general_dilated(y, p["w_sep_point"].reshape(F2, F2, 1, 1), (1, 1), "VALID",
                                 dimension_numbers=dn, precision=hp)
    y = bn(y, p["bn3_gamma"], p["bn3_beta"], p["bn3_mean"], p["bn3_var"])
    y = elu(y)
    y = y.reshape(B, F2, 1, (T // P1) // P2, P2).mean(-1)
    flat = y.reshape(B, -1)
    return jnp.dot(flat, p["w_fc"].T, precision=hp) + p["b_fc"][None, :]


if __name__ == "__main__":
    cfg = dict(n_channels=4, n_samples=64, n_classes=4,
               F1=8, D=2, K1=64, F2=16, K2=16, pool1=4, pool2=8)
    key = jax.random.PRNGKey(0)
    kx, kp = jax.random.split(key)
    x = jax.random.normal(kx, (2, cfg["n_channels"], cfg["n_samples"]), jnp.float32)
    params = init_params(kp, cfg)

    forward = jax.jit(functools.partial(eegnet_forward, cfg=cfg))
    out = jax.block_until_ready(forward(x, params))
    assert out.shape == (2, cfg["n_classes"]), out.shape

    ref = reference_forward(x, params, cfg)
    err = float(jnp.max(jnp.abs(out - ref)))
    if not jnp.allclose(out, ref, rtol=1e-2, atol=1e-2):
        raise AssertionError(f"mismatch vs reference, max abs err = {err}")
    print("KERNEL_OK")
</pallas_src>

<mosaic_0001>
module attributes {stable_mosaic.version = 11 : i64} {
  func.func @_eegnet_fused_kernel(%arg0: i32, %arg1: memref<16x256xbf16, #tpu.memory_space<vmem>>, %arg2: memref<256x1024xbf16, #tpu.memory_space<vmem>>, %arg3: memref<1x1024xf32, #tpu.memory_space<vmem>>, %arg4: memref<1024x256xbf16, #tpu.memory_space<vmem>>, %arg5: memref<1x256xf32, #tpu.memory_space<vmem>>, %arg6: memref<256x128xbf16, #tpu.memory_space<vmem>>, %arg7: memref<1x128xf32, #tpu.memory_space<vmem>>, %arg8: memref<16x128xf32, #tpu.memory_space<vmem>>) attributes {dimension_semantics = [#tpu.dimension_semantics<parallel>], iteration_bounds = array<i64: 1>, scalar_prefetch = 0 : i64, scratch_operands = 0 : i64, tpu.core_type = #tpu.core_type<tc>, window_params = [{transform_indices = @transform_0, window_bounds = array<i64: 16, 256>}, {pipeline_mode = #tpu.pipeline_mode<synchronous>, transform_indices = @transform_1, window_bounds = array<i64: 256, 1024>}, {pipeline_mode = #tpu.pipeline_mode<synchronous>, transform_indices = @transform_2, window_bounds = array<i64: 1, 1024>}, {pipeline_mode = #tpu.pipeline_mode<synchronous>, transform_indices = @transform_3, window_bounds = array<i64: 1024, 256>}, {pipeline_mode = #tpu.pipeline_mode<synchronous>, transform_indices = @transform_4, window_bounds = array<i64: 1, 256>}, {pipeline_mode = #tpu.pipeline_mode<synchronous>, transform_indices = @transform_5, window_bounds = array<i64: 256, 128>}, {pipeline_mode = #tpu.pipeline_mode<synchronous>, transform_indices = @transform_6, window_bounds = array<i64: 1, 128>}, {transform_indices = @transform_7, window_bounds = array<i64: 16, 128>}]} {
    %c0 = arith.constant 0 : index
    %c0_0 = arith.constant 0 : index
    %0 = vector.load %arg1[%c0, %c0_0] : memref<16x256xbf16, #tpu.memory_space<vmem>>, vector<16x256xbf16>
    %c0_1 = arith.constant 0 : index
    %c0_2 = arith.constant 0 : index
    %1 = vector.load %arg2[%c0_1, %c0_2] : memref<256x1024xbf16, #tpu.memory_space<vmem>>, vector<256x1024xbf16>
    %cst = arith.constant dense<0.000000e+00> : vector<16x1024xf32>
    %2 = tpu.matmul %0, %1, %cst {dimension_numbers = #tpu.dot_dimension_numbers<[1], [0], [0], [1], [0, 0, 1, 1], [], []>} : vector<16x256xbf16>, vector<256x1024xbf16>, vector<16x1024xf32> -> vector<16x1024xf32>
    %c0_3 = arith.constant 0 : index
    %c0_4 = arith.constant 0 : index
    %3 = vector.load %arg3[%c0_3, %c0_4] : memref<1x1024xf32, #tpu.memory_space<vmem>>, vector<1x1024xf32>
    %4 = vector.broadcast %3 : vector<1x1024xf32> to vector<16x1024xf32>
    %5 = arith.addf %2, %4 : vector<16x1024xf32>
    %cst_5 = arith.constant 0.000000e+00 : f32
    %6 = vector.broadcast %cst_5 : f32 to vector<16x1024xf32>
    %7 = arith.cmpf ogt, %5, %6 : vector<16x1024xf32>
    %8 = math.exp %5 : vector<16x1024xf32>
    %cst_6 = arith.constant 1.000000e+00 : f32
    %9 = vector.broadcast %cst_6 : f32 to vector<16x1024xf32>
    %10 = arith.subf %8, %9 : vector<16x1024xf32>
    %11 = arith.select %7, %5, %10 : vector<16x1024xi1>, vector<16x1024xf32>
    %12 = arith.truncf %11 : vector<16x1024xf32> to vector<16x1024xbf16>
    %c0_7 = arith.constant 0 : index
    %c0_8 = arith.constant 0 : index
    %13 = vector.load %arg4[%c0_7, %c0_8] : memref<1024x256xbf16, #tpu.memory_space<vmem>>, vector<1024x256xbf16>
    %cst_9 = arith.constant dense<0.000000e+00> : vector<16x256xf32>
    %14 = tpu.matmul %12, %13, %cst_9 {dimension_numbers = #tpu.dot_dimension_numbers<[1], [0], [0], [1], [0, 0, 1, 1], [], []>} : vector<16x1024xbf16>, vector<1024x256xbf16>, vector<16x256xf32> -> vector<16x256xf32>
    %c0_10 = arith.constant 0 : index
    %c0_11 = arith.constant 0 : index
    %15 = vector.load %arg5[%c0_10, %c0_11] : memref<1x256xf32, #tpu.memory_space<vmem>>, vector<1x256xf32>
    %16 = vector.broadcast %15 : vector<1x256xf32> to vector<16x256xf32>
    %17 = arith.addf %14, %16 : vector<16x256xf32>
    %cst_12 = arith.constant 0.000000e+00 : f32
    %18 = vector.broadcast %cst_12 : f32 to vector<16x256xf32>
    %19 = arith.cmpf ogt, %17, %18 : vector<16x256xf32>
    %20 = math.exp %17 : vector<16x256xf32>
    %cst_13 = arith.constant 1.000000e+00 : f32
    %21 = vector.broadcast %cst_13 : f32 to vector<16x256xf32>
    %22 = arith.subf %20, %21 : vector<16x256xf32>
    %23 = arith.select %19, %17, %22 : vector<16x256xi1>, vector<16x256xf32>
    %24 = arith.truncf %23 : vector<16x256xf32> to vector<16x256xbf16>
    %c0_14 = arith.constant 0 : index
    %c0_15 = arith.constant 0 : index
    %25 = vector.load %arg6[%c0_14, %c0_15] : memref<256x128xbf16, #tpu.memory_space<vmem>>, vector<256x128xbf16>
    %cst_16 = arith.constant dense<0.000000e+00> : vector<16x128xf32>
    %26 = tpu.matmul %24, %25, %cst_16 {dimension_numbers = #tpu.dot_dimension_numbers<[1], [0], [0], [1], [0, 0, 1, 1], [], []>} : vector<16x256xbf16>, vector<256x128xbf16>, vector<16x128xf32> -> vector<16x128xf32>
    %c0_17 = arith.constant 0 : index
    %c0_18 = arith.constant 0 : index
    %27 = vector.load %arg7[%c0_17, %c0_18] : memref<1x128xf32, #tpu.memory_space<vmem>>, vector<1x128xf32>
    %28 = vector.broadcast %27 : vector<1x128xf32> to vector<16x128xf32>
    %29 = arith.addf %26, %28 : vector<16x128xf32>
    %c0_19 = arith.constant 0 : index
    %c0_20 = arith.constant 0 : index
    %30 = vector.load %arg8[%c0_19, %c0_20] : memref<16x128xf32, #tpu.memory_space<vmem>>, vector<16x128xf32>
    tpu.vector_store %arg8[%c0_19, %c0_20], %29 {strides = array<i32>} : memref<16x128xf32, #tpu.memory_space<vmem>>, vector<16x128xf32>,
    return
  }
  func.func @transform_0(%arg0: i32) -> (i32, i32) {
    %c0_i32 = arith.constant 0 : i32
    %c0_i32_0 = arith.constant 0 : i32
    return %arg0, %c0_i32 : i32, i32
  }
  func.func @transform_1(%arg0: i32) -> (i32, i32) {
    %c0_i32 = arith.constant 0 : i32
    %c0_i32_0 = arith.constant 0 : i32
    %c0_i32_1 = arith.constant 0 : i32
    return %c0_i32, %c0_i32_0 : i32, i32
  }
  func.func @transform_2(%arg0: i32) -> (i32, i32) {
    %c0_i32 = arith.constant 0 : i32
    %c0_i32_0 = arith.constant 0 : i32
    %c0_i32_1 = arith.constant 0 : i32
    return %c0_i32, %c0_i32_0 : i32, i32
  }
  func.func @transform_3(%arg0: i32) -> (i32, i32) {
    %c0_i32 = arith.constant 0 : i32
    %c0_i32_0 = arith.constant 0 : i32
    %c0_i32_1 = arith.constant 0 : i32
    return %c0_i32, %c0_i32_0 : i32, i32
  }
  func.func @transform_4(%arg0: i32) -> (i32, i32) {
    %c0_i32 = arith.constant 0 : i32
    %c0_i32_0 = arith.constant 0 : i32
    %c0_i32_1 = arith.constant 0 : i32
    return %c0_i32, %c0_i32_0 : i32, i32
  }
  func.func @transform_5(%arg0: i32) -> (i32, i32) {
    %c0_i32 = arith.constant 0 : i32
    %c0_i32_0 = arith.constant 0 : i32
    %c0_i32_1 = arith.constant 0 : i32
    return %c0_i32, %c0_i32_0 : i32, i32
  }
  func.func @transform_6(%arg0: i32) -> (i32, i32) {
    %c0_i32 = arith.constant 0 : i32
    %c0_i32_0 = arith.constant 0 : i32
    %c0_i32_1 = arith.constant 0 : i32
    return %c0_i32, %c0_i32_0 : i32, i32
  }
  func.func @transform_7(%arg0: i32) -> (i32, i32) {
    %c0_i32 = arith.constant 0 : i32
    %c0_i32_0 = arith.constant 0 : i32
    return %arg0, %c0_i32 : i32, i32
  }
}

</mosaic_0001>

<bundles_post_ra>
// kernel: eegnet_forward.1
= control target key start
LH: loop header
LB: loop body
LE: loop exit
PB: predicated region body
PF: predicated region fallthrough
CT: control target
= control target key end

     0   :  { %s5548_s1 = inlined_call_operand.vmem [shape: bf16[256,1024], index: 1, kind: input, shape index: {}]   ;;  %s5549_s0 = inlined_call_operand.vmem [shape: bf16[16,256], index: 0, kind: input, shape index: {}]   ;;  %s5550_s3 = inlined_call_operand.vmem [shape: bf16[1024,256], index: 3, kind: input, shape index: {}]   ;;  %s5551_s2 = inlined_call_operand.vmem [shape: f32[1,1024], index: 2, kind: input, shape index: {}]   ;;  %s5552_s6 = inlined_call_operand.vmem [shape: f32[1,128], index: 6, kind: input, shape index: {}]   ;;  %s5553_s5 = inlined_call_operand.vmem [shape: bf16[256,128], index: 5, kind: input, shape index: {}]   ;;  %s5554_s4 = inlined_call_operand.vmem [shape: f32[1,256], index: 4, kind: input, shape index: {}]   ;;  %s5555_s7 = inlined_call_operand.vmem [shape: f32[16,128], index: 7, kind: output, shape index: {}]  }
   0x1   :  { %v2556_v0 = vld [vmem:[%s5548_s1 + $0x1c0] sm:$0xf]  ;;  %v3496_v5 = vld [vmem:[%s5548_s1 + $0x1c4] sm:$0xf] }
   0x2   :  { %v3500_v1 = vld [vmem:[%s5548_s1 + $0x1dc] sm:$0xf0]  ;;  %v2558_v6 = vld [vmem:[%s5548_s1 + $0x1e0] sm:$0xf0] }
   0x3   :  { %v2812_v2 = vld [vmem:[%s5548_s1 + $0x3c0] sm:$0xf]  ;;  %v2557_v3 = vor.u32 %v3500_v1, %v2556_v0  ;;  %v2561_v8 = vor.u32 %v3496_v5, %v2558_v6  ;;  %v3560_v9 = vld [vmem:[%s5548_s1 + $0x3c4] sm:$0xf] }
   0x4   :  { %v3564_v4 = vld [vmem:[%s5548_s1 + $0x3dc] sm:$0xf0]  ;;  %v2814_v10 = vld [vmem:[%s5548_s1 + $0x3e0] sm:$0xf0] }
   0x5   :  { %v2813_v7 = vor.u32 %v3564_v4, %v2812_v2  ;;  %v2524_v11 = vld [vmem:[%s5548_s1 + $0x180] sm:$0xf]  ;;  %824 = vmatpush.bf16.msra.mxu0 %v2557_v3  ;;  %v2817_v12 = vor.u32 %v3560_v9, %v2814_v10  ;;  %852 = vmatpush.bf16.msra.mxu2 %v2561_v8  ;;  %v3488_v18 = vld [vmem:[%s5548_s1 + $0x184] sm:$0xf] }
   0x6   :  { %v3492_v13 = vld [vmem:[%s5548_s1 + $0x19c] sm:$0xf0]  ;;  %v2526_v19 = vld [vmem:[%s5548_s1 + $0x1a0] sm:$0xf0] }
   0x7   :  { %v2780_v14 = vld [vmem:[%s5548_s1 + $0x380] sm:$0xf]  ;;  %838 = vmatpush.bf16.msra.mxu1 %v2813_v7  ;;  %v2525_v16 = vor.u32 %v3492_v13, %v2524_v11  ;;  %v3552_v20 = vld [vmem:[%s5548_s1 + $0x384] sm:$0xf]  ;;  %866 = vmatpush.bf16.msra.mxu3 %v2817_v12  ;;  %v2529_v21 = vor.u32 %v3488_v18, %v2526_v19 }
   0x8   :  { %v3556_v15 = vld [vmem:[%s5548_s1 + $0x39c] sm:$0xf0]  ;;  %v2782_v22 = vld [vmem:[%s5548_s1 + $0x3a0] sm:$0xf0] }
   0x9   :  { %v2781_v17 = vor.u32 %v3556_v15, %v2780_v14  ;;  %v2492_v23 = vld [vmem:[%s5548_s1 + $0x140] sm:$0xf]  ;;  %v2785_v25 = vor.u32 %v3552_v20, %v2782_v22  ;;  %v3480_v28 = vld [vmem:[%s5548_s1 + $0x144] sm:$0xf]  ;;  %825 = vmatpush.bf16.msra.mxu0 %v2525_v16  ;;  %853 = vmatpush.bf16.msra.mxu2 %v2529_v21 }
   0xa   :  { %v3484_v24 = vld [vmem:[%s5548_s1 + $0x15c] sm:$0xf0]  ;;  %v2494_v30 = vld [vmem:[%s5548_s1 + $0x160] sm:$0xf0] }
   0xb   :  { %v2748_v26 = vld [vmem:[%s5548_s1 + $0x340] sm:$0xf]  ;;  %v2493_v29 = vor.u32 %v3484_v24, %v2492_v23  ;;  %v3544_v31 = vld [vmem:[%s5548_s1 + $0x344] sm:$0xf]  ;;  %839 = vmatpush.bf16.msra.mxu1 %v2781_v17  ;;  %v2497_v34 = vor.u32 %v3480_v28, %v2494_v30  ;;  %867 = vmatpush.bf16.msra.mxu3 %v2785_v25  ;;  %v2564_v28 = vld [vmem:[%s5548_s1 + $0x1c8] sm:$0xf] }
   0xc   :  { %v3548_v27 = vld [vmem:[%s5548_s1 + $0x35c] sm:$0xf0]  ;;  %v2750_v32 = vld [vmem:[%s5548_s1 + $0x360] sm:$0xf0]  ;;  %v2820_v30 = vld [vmem:[%s5548_s1 + $0x3c8] sm:$0xf] }
   0xd   :  { %v2749_v33 = vor.u32 %v3548_v27, %v2748_v26  ;;  %v2460_v35 = vld [vmem:[%s5548_s1 + $0x100] sm:$0xf]  ;;  %v2753_v38 = vor.u32 %v3544_v31, %v2750_v32  ;;  %v3472_v40 = vld [vmem:[%s5548_s1 + $0x104] sm:$0xf]  ;;  %826 = vmatpush.bf16.msra.mxu0 %v2493_v29  ;;  %854 = vmatpush.bf16.msra.mxu2 %v2497_v34  ;;  %v3501_v29 = vld [vmem:[%s5548_s1 + $0x1e4] sm:$0xf0] }
   0xe   :  { %v3476_v36 = vld [vmem:[%s5548_s1 + $0x11c] sm:$0xf0]  ;;  %v2462_v41 = vld [vmem:[%s5548_s1 + $0x120] sm:$0xf0]  ;;  %v3565_v31 = vld [vmem:[%s5548_s1 + $0x3e4] sm:$0xf0] }
   0xf   :  { %v2716_v37 = vld [vmem:[%s5548_s1 + $0x300] sm:$0xf]  ;;  %v3536_v42 = vld [vmem:[%s5548_s1 + $0x304] sm:$0xf]  ;;  %v2461_v44 = vor.u32 %v3476_v36, %v2460_v35  ;;  %840 = vmatpush.bf16.msra.mxu1 %v2749_v33  ;;  %v2465_v46 = vor.u32 %v3472_v40, %v2462_v41  ;;  %868 = vmatpush.bf16.msra.mxu3 %v2753_v38  ;;  %v3497_v33 = vld [vmem:[%s5548_s1 + $0x1cc] sm:$0xf] }
  0x10   :  { %v3540_v39 = vld [vmem:[%s5548_s1 + $0x31c] sm:$0xf0]  ;;  %v2718_v43 = vld [vmem:[%s5548_s1 + $0x320] sm:$0xf0]  ;;  %v2566_v34 = vld [vmem:[%s5548_s1 + $0x1e8] sm:$0xf0] }
  0x11   :  { %v2717_v45 = vor.u32 %v3540_v39, %v2716_v37  ;;  %v2428_v47 = vld [vmem:[%s5548_s1 + $0xc0] sm:$0xf]  ;;  %v2721_v50 = vor.u32 %v3536_v42, %v2718_v43  ;;  %v3464_v52 = vld [vmem:[%s5548_s1 + $0xc4] sm:$0xf]  ;;  %827 = vmatpush.bf16.msra.mxu0 %v2461_v44  ;;  %855 = vmatpush.bf16.msra.mxu2 %v2465_v46  ;;  %v3561_v35 = vld [vmem:[%s5548_s1 + $0x3cc] sm:$0xf]  ;;  %v2565_v42 = vor.u32 %v3501_v29, %v2564_v28 }
  0x12   :  { %v3468_v48 = vld [vmem:[%s5548_s1 + $0xdc] sm:$0xf0]  ;;  %v2430_v53 = vld [vmem:[%s5548_s1 + $0xe0] sm:$0xf0]  ;;  %v2822_v38 = vld [vmem:[%s5548_s1 + $0x3e8] sm:$0xf0]  ;;  %v2569_v46 = vor.u32 %v3497_v33, %v2566_v34 }
  0x13   :  { %v2684_v49 = vld [vmem:[%s5548_s1 + $0x2c0] sm:$0xf]  ;;  %v3528_v54 = vld [vmem:[%s5548_s1 + $0x2c4] sm:$0xf]  ;;  %v2429_v56 = vor.u32 %v3468_v48, %v2428_v47  ;;  %841 = vmatpush.bf16.msra.mxu1 %v2717_v45  ;;  %v2433_v58 = vor.u32 %v3464_v52, %v2430_v53  ;;  %869 = vmatpush.bf16.msra.mxu3 %v2721_v50  ;;  %v3439_v40 = vld [vmem:[%s5549_s0 + $0x4] sm:$0xf0]  ;;  %v2821_v45 = vor.u32 %v3565_v31, %v2820_v30 }
  0x14   :  { %v3532_v51 = vld [vmem:[%s5548_s1 + $0x2dc] sm:$0xf0]  ;;  %v2686_v55 = vld [vmem:[%s5548_s1 + $0x2e0] sm:$0xf0]  ;;  %v2326_v44 = vld [vmem:[%s5549_s0 + $0x8] sm:$0xf0]  ;;  %v2825_v50 = vor.u32 %v3561_v35, %v2822_v38 }
  0x15   :  { %v2685_v57 = vor.u32 %v3532_v51, %v2684_v49  ;;  %v2396_v59 = vld [vmem:[%s5548_s1 + $0x80] sm:$0xf]  ;;  %v2689_v62 = vor.u32 %v3528_v54, %v2686_v55  ;;  %v3456_v0 = vld [vmem:[%s5548_s1 + $0x84] sm:$0xf]  ;;  %828 = vmatpush.bf16.msra.mxu0 %v2429_v56  ;;  %856 = vmatpush.bf16.msra.mxu2 %v2433_v58  ;;  %v2532_v47 = vld [vmem:[%s5548_s1 + $0x188] sm:$0xf] }
  0x16   :  { %v3460_v60 = vld [vmem:[%s5548_s1 + $0x9c] sm:$0xf0]  ;;  %v2398_v1 = vld [vmem:[%s5548_s1 + $0xa0] sm:$0xf0]  ;;  %v3493_v48 = vld [vmem:[%s5548_s1 + $0x1a4] sm:$0xf0] }
  0x17   :  { %v2652_v61 = vld [vmem:[%s5548_s1 + $0x280] sm:$0xf]  ;;  %v3520_v2 = vld [vmem:[%s5548_s1 + $0x284] sm:$0xf]  ;;  %v2397_v4 = vor.u32 %v3460_v60, %v2396_v59  ;;  %842 = vmatpush.bf16.msra.mxu1 %v2685_v57  ;;  %v2401_v6 = vor.u32 %v3456_v0, %v2398_v1  ;;  %870 = vmatpush.bf16.msra.mxu3 %v2689_v62  ;;  %v2788_v49 = vld [vmem:[%s5548_s1 + $0x388] sm:$0xf]  ;;  %v2533_v58 = vor.u32 %v3493_v48, %v2532_v47 }
  0x18   :  { %v3524_v63 = vld [vmem:[%s5548_s1 + $0x29c] sm:$0xf0]  ;;  %v2654_v3 = vld [vmem:[%s5548_s1 + $0x2a0] sm:$0xf0]  ;;  %v3557_v52 = vld [vmem:[%s5548_s1 + $0x3a4] sm:$0xf0] }
  0x19   :  { %v2653_v5 = vor.u32 %v3524_v63, %v2652_v61  ;;  %v2364_v7 = vld [vmem:[%s5548_s1 + $0x40] sm:$0xf]  ;;  %v2657_v10 = vor.u32 %v3520_v2, %v2654_v3  ;;  %v3448_v12 = vld [vmem:[%s5548_s1 + $0x44] sm:$0xf]  ;;  %829 = vmatpush.bf16.msra.mxu0 %v2397_v4  ;;  %857 = vmatpush.bf16.msra.mxu2 %v2401_v6  ;;  %v3489_v53 = vld [vmem:[%s5548_s1 + $0x18c] sm:$0xf]  ;;  %v2789_v59 = vor.u32 %v3557_v52, %v2788_v49 }
  0x1a   :  { %v3452_v8 = vld [vmem:[%s5548_s1 + $0x5c] sm:$0xf0]  ;;  %v2366_v13 = vld [vmem:[%s5548_s1 + $0x60] sm:$0xf0]  ;;  %v2534_v54 = vld [vmem:[%s5548_s1 + $0x1a8] sm:$0xf0] }
  0x1b   :  { %v2620_v9 = vld [vmem:[%s5548_s1 + $0x240] sm:$0xf]  ;;  %v3512_v14 = vld [vmem:[%s5548_s1 + $0x244] sm:$0xf]  ;;  %v2365_v16 = vor.u32 %v3452_v8, %v2364_v7  ;;  %843 = vmatpush.bf16.msra.mxu1 %v2653_v5  ;;  %v2369_v21 = vor.u32 %v3448_v12, %v2366_v13  ;;  %871 = vmatpush.bf16.msra.mxu3 %v2657_v10  ;;  %v3553_v56 = vld [vmem:[%s5548_s1 + $0x38c] sm:$0xf]  ;;  %v2537_v60 = vor.u32 %v3489_v53, %v2534_v54 }
  0x1c   :  { %v3516_v11 = vld [vmem:[%s5548_s1 + $0x25c] sm:$0xf0]  ;;  %v2622_v15 = vld [vmem:[%s5548_s1 + $0x260] sm:$0xf0]  ;;  %v2790_v57 = vld [vmem:[%s5548_s1 + $0x3a8] sm:$0xf0] }
  0x1d   :  { %v2332_v17 = vld [vmem:[%s5548_s1] sm:$0xf]  ;;  %v2621_v20 = vor.u32 %v3516_v11, %v2620_v9  ;;  %v3440_v23 = vld [vmem:[%s5548_s1 + $0x4] sm:$0xf]  ;;  %v2625_v25 = vor.u32 %v3512_v14, %v2622_v15  ;;  %830 = vmatpush.bf16.msra.mxu0 %v2365_v16  ;;  %858 = vmatpush.bf16.msra.mxu2 %v2369_v21  ;;  %v2500_v61 = vld [vmem:[%s5548_s1 + $0x148] sm:$0xf]  ;;  %v2793_v0 = vor.u32 %v3553_v56, %v2790_v57 }
  0x1e   :  { %v3444_v18 = vld [vmem:[%s5548_s1 + $0x1c] sm:$0xf0]  ;;  %v2334_v24 = vld [vmem:[%s5548_s1 + $0x20] sm:$0xf0]  ;;  %v3485_v62 = vld [vmem:[%s5548_s1 + $0x164] sm:$0xf0] }
  0x1f   :  { %v2588_v19 = vld [vmem:[%s5548_s1 + $0x200] sm:$0xf]  ;;  %v3504_v26 = vld [vmem:[%s5548_s1 + $0x204] sm:$0xf]  ;;  %v2333_v32 = vor.u32 %v3444_v18, %v2332_v17  ;;  %844 = vmatpush.bf16.msra.mxu1 %v2621_v20  ;;  %v2337_v37 = vor.u32 %v3440_v23, %v2334_v24  ;;  %872 = vmatpush.bf16.msra.mxu3 %v2625_v25  ;;  %v2756_v63 = vld [vmem:[%s5548_s1 + $0x348] sm:$0xf]  ;;  %v2501_v6 = vor.u32 %v3485_v62, %v2500_v61 }
  0x20   :  { %v3508_v22 = vld [vmem:[%s5548_s1 + $0x21c] sm:$0xf0]  ;;  %v2590_v27 = vld [vmem:[%s5548_s1 + $0x220] sm:$0xf0]  ;;  %v3549_v1 = vld [vmem:[%s5548_s1 + $0x364] sm:$0xf0] }
  0x21   :  { %v2589_v36 = vor.u32 %v3508_v22, %v2588_v19  ;;  %v2324_v39 = vld [vmem:[%s5549_s0] sm:$0xf]  ;;  %v2593_v41 = vor.u32 %v3504_v26, %v2590_v27  ;;  %v3438_v43 = vld [vmem:[%s5549_s0 + $0x4] sm:$0xf]  ;;  %831 = vmatpush.bf16.msra.mxu0 %v2333_v32  ;;  %859 = vmatpush.bf16.msra.mxu2 %v2337_v37  ;;  %v3481_v2 = vld [vmem:[%s5548_s1 + $0x14c] sm:$0xf]  ;;  %v2757_v7 = vor.u32 %v3549_v1, %v2756_v63 }
  0x22   :  { %v4030_v51 = vor.u32 %v3439_v40, %v2324_v39  ;;  %v4041_v55 = vor.u32 %v3438_v43, %v2326_v44  ;;  %v2502_v3 = vld [vmem:[%s5548_s1 + $0x168] sm:$0xf0]  ;;  %v2468_v9 = vld [vmem:[%s5548_s1 + $0x108] sm:$0xf] }
  0x23   :  { %845 = vmatpush.bf16.msra.mxu1 %v2589_v36  ;;  %873 = vmatpush.bf16.msra.mxu3 %v2593_v41  ;;  %v3545_v4 = vld [vmem:[%s5548_s1 + $0x34c] sm:$0xf]  ;;  %v2505_v8 = vor.u32 %v3481_v2, %v2502_v3  ;;  %v3477_v10 = vld [vmem:[%s5548_s1 + $0x124] sm:$0xf0] }
  0x24   :  { %860 = vmatmul.bf16.vlgmr.msra.gmra.mxu2 %v4030_v51  ;;  %832 = vmatmul.bf16.vlgmr.msra.gmra.mxu0 %v4030_v51  ;;  %v2758_v5 = vld [vmem:[%s5548_s1 + $0x368] sm:$0xf0]  ;;  %v2724_v11 = vld [vmem:[%s5548_s1 + $0x308] sm:$0xf]  ;;  %v2469_v18 = vor.u32 %v3477_v10, %v2468_v9  ;;  %v3498_v9 = vld [vmem:[%s5548_s1 + $0x1d4] sm:$0xf] }
  0x25   :  { %880 = vmatpush.bf16.msrb.mxu0 %v2565_v42  ;;  %908 = vmatpush.bf16.msrb.mxu2 %v2569_v46  ;;  %v2761_v12 = vor.u32 %v3545_v4, %v2758_v5  ;;  %v3541_v13 = vld [vmem:[%s5548_s1 + $0x324] sm:$0xf0]  ;;  %v3473_v14 = vld [vmem:[%s5548_s1 + $0x10c] sm:$0xf]  ;;  %v2572_v4 = vld [vmem:[%s5548_s1 + $0x1d0] sm:$0xf] }
  0x26   :  { %874 = vmatmul.bf16.vlgmr.msra.gmra.mxu3 %v4041_v55  ;;  %846 = vmatmul.bf16.vlgmr.msra.gmra.mxu1 %v4041_v55  ;;  %v2470_v15 = vld [vmem:[%s5548_s1 + $0x128] sm:$0xf0]  ;;  %v2725_v19 = vor.u32 %v3541_v13, %v2724_v11  ;;  %v2436_v21 = vld [vmem:[%s5548_s1 + $0xc8] sm:$0xf]  ;;  %v3502_v5 = vld [vmem:[%s5548_s1 + $0x1ec] sm:$0xf0] }
  0x27   :  { %894 = vmatpush.bf16.msrb.mxu1 %v2821_v45  ;;  %922 = vmatpush.bf16.msrb.mxu3 %v2825_v50  ;;  %v3537_v16 = vld [vmem:[%s5548_s1 + $0x30c] sm:$0xf]  ;;  %v2473_v20 = vor.u32 %v3473_v14, %v2470_v15  ;;  %v3469_v22 = vld [vmem:[%s5548_s1 + $0xe4] sm:$0xf0]  ;;  %v2574_v10 = vld [vmem:[%s5548_s1 + $0x1f0] sm:$0xf0] }
  0x28   :  { %v2726_v17 = vld [vmem:[%s5548_s1 + $0x328] sm:$0xf0]  ;;  %v2692_v23 = vld [vmem:[%s5548_s1 + $0x2c8] sm:$0xf]  ;;  %v2437_v30 = vor.u32 %v3469_v22, %v2436_v21  ;;  %v3562_v13 = vld [vmem:[%s5548_s1 + $0x3d4] sm:$0xf] }
  0x29   :  { %881 = vmatpush.bf16.msrb.mxu0 %v2533_v58  ;;  %909 = vmatpush.bf16.msrb.mxu2 %v2537_v60  ;;  %v2729_v24 = vor.u32 %v3537_v16, %v2726_v17  ;;  %v3533_v25 = vld [vmem:[%s5548_s1 + $0x2e4] sm:$0xf0]  ;;  %v3465_v26 = vld [vmem:[%s5548_s1 + $0xcc] sm:$0xf]  ;;  %v2830_v14 = vld [vmem:[%s5548_s1 + $0x3f0] sm:$0xf0]  ;;  %v2573_v16 = vor.u32 %v3502_v5, %v2572_v4 }
  0x2a   :  { %v2438_v27 = vld [vmem:[%s5548_s1 + $0xe8] sm:$0xf0]  ;;  %v2693_v31 = vor.u32 %v3533_v25, %v2692_v23  ;;  %v2404_v33 = vld [vmem:[%s5548_s1 + $0x88] sm:$0xf]  ;;  %v2796_v21 = vld [vmem:[%s5548_s1 + $0x390] sm:$0xf]  ;;  %v2833_v22 = vor.u32 %v3562_v13, %v2830_v14 }
  0x2b   :  { %895 = vmatpush.bf16.msrb.mxu1 %v2789_v59  ;;  %923 = vmatpush.bf16.msrb.mxu3 %v2793_v0  ;;  %v3529_v28 = vld [vmem:[%s5548_s1 + $0x2cc] sm:$0xf]  ;;  %v2441_v32 = vor.u32 %v3465_v26, %v2438_v27  ;;  %v3461_v34 = vld [vmem:[%s5548_s1 + $0xa4] sm:$0xf0]  ;;  %v3558_v23 = vld [vmem:[%s5548_s1 + $0x3ac] sm:$0xf0] }
  0x2c   :  { %v2694_v29 = vld [vmem:[%s5548_s1 + $0x2e8] sm:$0xf0]  ;;  %v2660_v35 = vld [vmem:[%s5548_s1 + $0x288] sm:$0xf]  ;;  %v2405_v42 = vor.u32 %v3461_v34, %v2404_v33  ;;  %v2542_v25 = vld [vmem:[%s5548_s1 + $0x1b0] sm:$0xf0] }
  0x2d   :  { %882 = vmatpush.bf16.msrb.mxu0 %v2501_v6  ;;  %910 = vmatpush.bf16.msrb.mxu2 %v2505_v8  ;;  %v2697_v36 = vor.u32 %v3529_v28, %v2694_v29  ;;  %v3525_v37 = vld [vmem:[%s5548_s1 + $0x2a4] sm:$0xf0]  ;;  %v3457_v38 = vld [vmem:[%s5548_s1 + $0x8c] sm:$0xf]  ;;  %v2828_v6 = vld [vmem:[%s5548_s1 + $0x3d0] sm:$0xf]  ;;  %v2797_v29 = vor.u32 %v3558_v23, %v2796_v21 }
  0x2e   :  { %v2406_v39 = vld [vmem:[%s5548_s1 + $0xa8] sm:$0xf0]  ;;  %v2661_v43 = vor.u32 %v3525_v37, %v2660_v35  ;;  %v2372_v45 = vld [vmem:[%s5548_s1 + $0x48] sm:$0xf]  ;;  %v3566_v8 = vld [vmem:[%s5548_s1 + $0x3ec] sm:$0xf0] }
  0x2f   :  { %896 = vmatpush.bf16.msrb.mxu1 %v2757_v7  ;;  %924 = vmatpush.bf16.msrb.mxu3 %v2761_v12  ;;  %v3521_v40 = vld [vmem:[%s5548_s1 + $0x28c] sm:$0xf]  ;;  %v2409_v44 = vor.u32 %v3457_v38, %v2406_v39  ;;  %v3453_v46 = vld [vmem:[%s5548_s1 + $0x64] sm:$0xf0]  ;;  %v2829_v17 = vor.u32 %v3566_v8, %v2828_v6  ;;  %v3554_v26 = vld [vmem:[%s5548_s1 + $0x394] sm:$0xf] }
  0x30   :  { %v2662_v41 = vld [vmem:[%s5548_s1 + $0x2a8] sm:$0xf0]  ;;  %v2628_v47 = vld [vmem:[%s5548_s1 + $0x248] sm:$0xf]  ;;  %v2373_v56 = vor.u32 %v3453_v46, %v2372_v45  ;;  %v2798_v27 = vld [vmem:[%s5548_s1 + $0x3b0] sm:$0xf0] }
  0x31   :  { %883 = vmatpush.bf16.msrb.mxu0 %v2469_v18  ;;  %911 = vmatpush.bf16.msrb.mxu2 %v2473_v20  ;;  %v2665_v48 = vor.u32 %v3521_v40, %v2662_v41  ;;  %v3517_v49 = vld [vmem:[%s5548_s1 + $0x264] sm:$0xf0]  ;;  %v3449_v50 = vld [vmem:[%s5548_s1 + $0x4c] sm:$0xf]  ;;  %v2577_v18 = vor.u32 %v3498_v9, %v2574_v10  ;;  %v3494_v20 = vld [vmem:[%s5548_s1 + $0x1ac] sm:$0xf0]  ;;  %v2801_v34 = vor.u32 %v3554_v26, %v2798_v27 }
  0x32   :  { %v2374_v52 = vld [vmem:[%s5548_s1 + $0x68] sm:$0xf0]  ;;  %v2340_v57 = vld [vmem:[%s5548_s1 + $0x8] sm:$0xf]  ;;  %v2629_v59 = vor.u32 %v3517_v49, %v2628_v47  ;;  %v2764_v33 = vld [vmem:[%s5548_s1 + $0x350] sm:$0xf] }
  0x33   :  { %897 = vmatpush.bf16.msrb.mxu1 %v2725_v19  ;;  %925 = vmatpush.bf16.msrb.mxu3 %v2729_v24  ;;  %v3513_v53 = vld [vmem:[%s5548_s1 + $0x24c] sm:$0xf]  ;;  %v3445_v58 = vld [vmem:[%s5548_s1 + $0x24] sm:$0xf0]  ;;  %v2377_v60 = vor.u32 %v3449_v50, %v2374_v52  ;;  %v2540_v19 = vld [vmem:[%s5548_s1 + $0x190] sm:$0xf] }
  0x34   :  { %v2630_v54 = vld [vmem:[%s5548_s1 + $0x268] sm:$0xf0]  ;;  %v2596_v61 = vld [vmem:[%s5548_s1 + $0x208] sm:$0xf]  ;;  %v2341_v7 = vor.u32 %v3445_v58, %v2340_v57  ;;  %v3490_v24 = vld [vmem:[%s5548_s1 + $0x194] sm:$0xf]  ;;  %v2541_v28 = vor.u32 %v3494_v20, %v2540_v19 }
  0x35   :  { %884 = vmatpush.bf16.msrb.mxu0 %v2437_v30  ;;  %912 = vmatpush.bf16.msrb.mxu2 %v2441_v32  ;;  %v3509_v62 = vld [vmem:[%s5548_s1 + $0x224] sm:$0xf0]  ;;  %v3441_v63 = vld [vmem:[%s5548_s1 + $0xc] sm:$0xf]  ;;  %v2633_v0 = vor.u32 %v3513_v53, %v2630_v54  ;;  %v2545_v30 = vor.u32 %v3490_v24, %v2542_v25  ;;  %v3486_v32 = vld [vmem:[%s5548_s1 + $0x16c] sm:$0xf0] }
  0x36   :  { %v2342_v1 = vld [vmem:[%s5548_s1 + $0x28] sm:$0xf0]  ;;  %v2597_v11 = vor.u32 %v3509_v62, %v2596_v61  ;;  %v3550_v35 = vld [vmem:[%s5548_s1 + $0x36c] sm:$0xf0]  ;;  %v2510_v37 = vld [vmem:[%s5548_s1 + $0x170] sm:$0xf0] }
  0x37   :  { %898 = vmatpush.bf16.msrb.mxu1 %v2693_v31  ;;  %926 = vmatpush.bf16.msrb.mxu3 %v2697_v36  ;;  %v3505_v2 = vld [vmem:[%s5548_s1 + $0x20c] sm:$0xf]  ;;  %v2345_v12 = vor.u32 %v3441_v63, %v2342_v1  ;;  %v2508_v31 = vld [vmem:[%s5548_s1 + $0x150] sm:$0xf]  ;;  %v3482_v36 = vld [vmem:[%s5548_s1 + $0x154] sm:$0xf]  ;;  %v2765_v41 = vor.u32 %v3550_v35, %v2764_v33 }
  0x38   :  { %v2598_v3 = vld [vmem:[%s5548_s1 + $0x228] sm:$0xf0]  ;;  %v3546_v38 = vld [vmem:[%s5548_s1 + $0x354] sm:$0xf]  ;;  %v2509_v40 = vor.u32 %v3486_v32, %v2508_v31  ;;  %v2732_v45 = vld [vmem:[%s5548_s1 + $0x310] sm:$0xf] }
  0x39   :  { %885 = vmatpush.bf16.msrb.mxu0 %v2405_v42  ;;  %913 = vmatpush.bf16.msrb.mxu2 %v2409_v44  ;;  %v2601_v15 = vor.u32 %v3505_v2, %v2598_v3  ;;  %v2766_v39 = vld [vmem:[%s5548_s1 + $0x370] sm:$0xf0]  ;;  %v2513_v42 = vor.u32 %v3482_v36, %v2510_v37  ;;  %v3478_v44 = vld [vmem:[%s5548_s1 + $0x12c] sm:$0xf0] }
  0x3a   :  { %v2769_v46 = vor.u32 %v3546_v38, %v2766_v39  ;;  %v3542_v47 = vld [vmem:[%s5548_s1 + $0x32c] sm:$0xf0]  ;;  %v2478_v49 = vld [vmem:[%s5548_s1 + $0x130] sm:$0xf0]  ;;  %v2580_v38 = vld [vmem:[%s5548_s1 + $0x1d8] sm:$0xf] }
  0x3b   :  { %899 = vmatpush.bf16.msrb.mxu1 %v2661_v43  ;;  %927 = vmatpush.bf16.msrb.mxu3 %v2665_v48  ;;  %v2476_v43 = vld [vmem:[%s5548_s1 + $0x110] sm:$0xf]  ;;  %v3474_v48 = vld [vmem:[%s5548_s1 + $0x114] sm:$0xf]  ;;  %v2733_v54 = vor.u32 %v3542_v47, %v2732_v45  ;;  %v3503_v39 = vld [vmem:[%s5548_s1 + $0x1f4] sm:$0xf0] }
  0x3c   :  { %v3538_v50 = vld [vmem:[%s5548_s1 + $0x314] sm:$0xf]  ;;  %v2477_v53 = vor.u32 %v3478_v44, %v2476_v43  ;;  %v2444_v57 = vld [vmem:[%s5548_s1 + $0xd0] sm:$0xf]  ;;  %v3499_v43 = vld [vmem:[%s5548_s1 + $0x1dc] sm:$0xf] }
  0x3d   :  { %886 = vmatpush.bf16.msrb.mxu0 %v2373_v56  ;;  %914 = vmatpush.bf16.msrb.mxu2 %v2377_v60  ;;  %v2734_v52 = vld [vmem:[%s5548_s1 + $0x330] sm:$0xf0]  ;;  %v2481_v56 = vor.u32 %v3474_v48, %v2478_v49  ;;  %v3470_v58 = vld [vmem:[%s5548_s1 + $0xec] sm:$0xf0]  ;;  %v2582_v44 = vld [vmem:[%s5548_s1 + $0x1f8] sm:$0xf0] }
  0x3e   :  { %v2737_v60 = vor.u32 %v3538_v50, %v2734_v52  ;;  %v3534_v61 = vld [vmem:[%s5548_s1 + $0x2ec] sm:$0xf0]  ;;  %v3466_v62 = vld [vmem:[%s5548_s1 + $0xd4] sm:$0xf]  ;;  %v2445_v2 = vor.u32 %v3470_v58, %v2444_v57  ;;  %v3563_v47 = vld [vmem:[%s5548_s1 + $0x3dc] sm:$0xf]  ;;  %v2581_v50 = vor.u32 %v3503_v39, %v2580_v38 }
  0x3f   :  { %900 = vmatpush.bf16.msrb.mxu1 %v2629_v59  ;;  %928 = vmatpush.bf16.msrb.mxu3 %v2633_v0  ;;  %v2700_v59 = vld [vmem:[%s5548_s1 + $0x2d0] sm:$0xf]  ;;  %v2446_v63 = vld [vmem:[%s5548_s1 + $0xf0] sm:$0xf0]  ;;  %v2838_v48 = vld [vmem:[%s5548_s1 + $0x3f8] sm:$0xf0] }
  0x40   :  { %v3530_v0 = vld [vmem:[%s5548_s1 + $0x2d4] sm:$0xf]  ;;  %v2701_v3 = vor.u32 %v3534_v61, %v2700_v59  ;;  %v2449_v4 = vor.u32 %v3466_v62, %v2446_v63  ;;  %v2412_v5 = vld [vmem:[%s5548_s1 + $0x90] sm:$0xf]  ;;  %v2804_v57 = vld [vmem:[%s5548_s1 + $0x398] sm:$0xf]  ;;  %v2841_v58 = vor.u32 %v3563_v47, %v2838_v48 }
  0x41   :  { %887 = vmatpush.bf16.msrb.mxu0 %v2341_v7  ;;  %915 = vmatpush.bf16.msrb.mxu2 %v2345_v12  ;;  %v2702_v1 = vld [vmem:[%s5548_s1 + $0x2f0] sm:$0xf0]  ;;  %v3462_v6 = vld [vmem:[%s5548_s1 + $0xac] sm:$0xf0]  ;;  %v3559_v59 = vld [vmem:[%s5548_s1 + $0x3b4] sm:$0xf0] }
  0x42   :  { %v2668_v7 = vld [vmem:[%s5548_s1 + $0x290] sm:$0xf]  ;;  %v2705_v8 = vor.u32 %v3530_v0, %v2702_v1  ;;  %v3458_v10 = vld [vmem:[%s5548_s1 + $0x94] sm:$0xf]  ;;  %v2413_v14 = vor.u32 %v3462_v6, %v2412_v5  ;;  %v2550_v61 = vld [vmem:[%s5548_s1 + $0x1b8] sm:$0xf0]  ;;  %v2805_v1 = vor.u32 %v3559_v59, %v2804_v57 }
  0x43   :  { %901 = vmatpush.bf16.msrb.mxu1 %v2597_v11  ;;  %929 = vmatpush.bf16.msrb.mxu3 %v2601_v15  ;;  %v3526_v9 = vld [vmem:[%s5548_s1 + $0x2ac] sm:$0xf0]  ;;  %v2414_v11 = vld [vmem:[%s5548_s1 + $0xb0] sm:$0xf0]  ;;  %v3555_v62 = vld [vmem:[%s5548_s1 + $0x39c] sm:$0xf] }
  0x44   :  { %888 = vmatmul.bf16.vlgmr.msrb.gmra.mxu0 %v4030_v51  ;;  %916 = vmatmul.bf16.vlgmr.msrb.gmra.mxu2 %v4030_v51  ;;  %v3522_v12 = vld [vmem:[%s5548_s1 + $0x294] sm:$0xf]  ;;  %v2669_v15 = vor.u32 %v3526_v9, %v2668_v7  ;;  %v2636_v19 = vld [vmem:[%s5548_s1 + $0x250] sm:$0xf]  ;;  %v2806_v63 = vld [vmem:[%s5548_s1 + $0x3b8] sm:$0xf0] }
  0x45   :  { %936 = vmatpush.bf16.msra.mxu0 %v2573_v16  ;;  %964 = vmatpush.bf16.msra.mxu2 %v2577_v18  ;;  %v2670_v13 = vld [vmem:[%s5548_s1 + $0x2b0] sm:$0xf0]  ;;  %v2417_v16 = vor.u32 %v3458_v10, %v2414_v11  ;;  %v3454_v18 = vld [vmem:[%s5548_s1 + $0x6c] sm:$0xf0]  ;;  %v2772_v5 = vld [vmem:[%s5548_s1 + $0x358] sm:$0xf]  ;;  %v2809_v6 = vor.u32 %v3555_v62, %v2806_v63 }
  0x46   :  { %902 = vmatmul.bf16.vlgmr.msrb.gmra.mxu1 %v4041_v55  ;;  %930 = vmatmul.bf16.vlgmr.msrb.gmra.mxu3 %v4041_v55  ;;  %v2673_v20 = vor.u32 %v3522_v12, %v2670_v13  ;;  %v3518_v21 = vld [vmem:[%s5548_s1 + $0x26c] sm:$0xf0]  ;;  %v2382_v23 = vld [vmem:[%s5548_s1 + $0x70] sm:$0xf0]  ;;  %v3551_v7 = vld [vmem:[%s5548_s1 + $0x374] sm:$0xf0] }
  0x47   :  { %950 = vmatpush.bf16.msra.mxu1 %v2829_v17  ;;  %978 = vmatpush.bf16.msra.mxu3 %v2833_v22  ;;  %v2380_v17 = vld [vmem:[%s5548_s1 + $0x50] sm:$0xf]  ;;  %v3450_v22 = vld [vmem:[%s5548_s1 + $0x54] sm:$0xf]  ;;  %v2518_v9 = vld [vmem:[%s5548_s1 + $0x178] sm:$0xf0]  ;;  %v2773_v13 = vor.u32 %v3551_v7, %v2772_v5 }
  0x48   :  { %v3514_v24 = vld [vmem:[%s5548_s1 + $0x254] sm:$0xf]  ;;  %v2381_v26 = vor.u32 %v3454_v18, %v2380_v17  ;;  %v2348_v27 = vld [vmem:[%s5548_s1 + $0x10] sm:$0xf]  ;;  %v3547_v10 = vld [vmem:[%s5548_s1 + $0x35c] sm:$0xf] }
  0x49   :  { %937 = vmatpush.bf16.msra.mxu0 %v2541_v28  ;;  %965 = vmatpush.bf16.msra.mxu2 %v2545_v30  ;;  %v2638_v25 = vld [vmem:[%s5548_s1 + $0x270] sm:$0xf0]  ;;  %v3446_v28 = vld [vmem:[%s5548_s1 + $0x2c] sm:$0xf0]  ;;  %v2385_v30 = vor.u32 %v3450_v22, %v2382_v23  ;;  %v2774_v11 = vld [vmem:[%s5548_s1 + $0x378] sm:$0xf0] }
  0x4a   :  { %v2604_v31 = vld [vmem:[%s5548_s1 + $0x210] sm:$0xf]  ;;  %v3442_v33 = vld [vmem:[%s5548_s1 + $0x14] sm:$0xf]  ;;  %v2740_v17 = vld [vmem:[%s5548_s1 + $0x318] sm:$0xf]  ;;  %v2777_v18 = vor.u32 %v3547_v10, %v2774_v11 }
  0x4b   :  { %951 = vmatpush.bf16.msra.mxu1 %v2797_v29  ;;  %979 = vmatpush.bf16.msra.mxu3 %v2801_v34  ;;  %v2637_v29 = vor.u32 %v3518_v21, %v2636_v19  ;;  %v3510_v32 = vld [vmem:[%s5548_s1 + $0x22c] sm:$0xf0]  ;;  %v2641_v34 = vor.u32 %v3514_v24, %v2638_v25  ;;  %v2350_v35 = vld [vmem:[%s5548_s1 + $0x30] sm:$0xf0]  ;;  %v3543_v19 = vld [vmem:[%s5548_s1 + $0x334] sm:$0xf0] }
  0x4c   :  { %v3506_v36 = vld [vmem:[%s5548_s1 + $0x214] sm:$0xf]  ;;  %v2605_v45 = vor.u32 %v3510_v32, %v2604_v31  ;;  %v2486_v21 = vld [vmem:[%s5548_s1 + $0x138] sm:$0xf0]  ;;  %v2741_v25 = vor.u32 %v3543_v19, %v2740_v17  ;;  %v3535_v31 = vld [vmem:[%s5548_s1 + $0x2f4] sm:$0xf0] }
  0x4d   :  { %938 = vmatpush.bf16.msra.mxu0 %v2509_v40  ;;  %966 = vmatpush.bf16.msra.mxu2 %v2513_v42  ;;  %v2606_v37 = vld [vmem:[%s5548_s1 + $0x230] sm:$0xf0]  ;;  %v2836_v40 = vld [vmem:[%s5548_s1 + $0x3d8] sm:$0xf]  ;;  %v3539_v22 = vld [vmem:[%s5548_s1 + $0x31c] sm:$0xf] }
  0x4e   :  { %v3567_v42 = vld [vmem:[%s5548_s1 + $0x3f4] sm:$0xf0]  ;;  %v2609_v49 = vor.u32 %v3506_v36, %v2606_v37  ;;  %v2742_v23 = vld [vmem:[%s5548_s1 + $0x338] sm:$0xf0]  ;;  %v2916_v10 = vld [vmem:[%s5550_s3 + $0x70] sm:$0xf] }
  0x4f   :  { %952 = vmatpush.bf16.msra.mxu1 %v2765_v41  ;;  %980 = vmatpush.bf16.msra.mxu3 %v2769_v46  ;;  %v2349_v41 = vor.u32 %v3446_v28, %v2348_v27  ;;  %v2353_v46 = vor.u32 %v3442_v33, %v2350_v35  ;;  %v2837_v52 = vor.u32 %v3567_v42, %v2836_v40  ;;  %v2452_v27 = vld [vmem:[%s5548_s1 + $0xd8] sm:$0xf]  ;;  %v3467_v32 = vld [vmem:[%s5548_s1 + $0xdc] sm:$0xf] }
  0x50   :  { %v3471_v28 = vld [vmem:[%s5548_s1 + $0xf4] sm:$0xf0]  ;;  %v2454_v33 = vld [vmem:[%s5548_s1 + $0xf8] sm:$0xf0] }
  0x51   :  { %939 = vmatpush.bf16.msra.mxu0 %v2477_v53  ;;  %967 = vmatpush.bf16.msra.mxu2 %v2481_v56  ;;  %v2585_v53 = vor.u32 %v3499_v43, %v2582_v44  ;;  %v3495_v56 = vld [vmem:[%s5548_s1 + $0x1b4] sm:$0xf0]  ;;  %v2710_v35 = vld [vmem:[%s5548_s1 + $0x2f8] sm:$0xf0]  ;;  %v2453_v36 = vor.u32 %v3471_v28, %v2452_v27  ;;  %v2457_v38 = vor.u32 %v3467_v32, %v2454_v33  ;;  %v2956_v33 = vld [vmem:[%s5550_s3 + $0xc0] sm:$0xf] }
  0x52   :  { %v2420_v39 = vld [vmem:[%s5548_s1 + $0x98] sm:$0xf]  ;;  %v3459_v44 = vld [vmem:[%s5548_s1 + $0x9c] sm:$0xf] }
  0x53   :  { %953 = vmatpush.bf16.msra.mxu1 %v2733_v54  ;;  %981 = vmatpush.bf16.msra.mxu3 %v2737_v60  ;;  %v2548_v54 = vld [vmem:[%s5548_s1 + $0x198] sm:$0xf]  ;;  %v3491_v60 = vld [vmem:[%s5548_s1 + $0x19c] sm:$0xf] }
  0x54   :  { %v2549_v0 = vor.u32 %v3495_v56, %v2548_v54  ;;  %v3463_v40 = vld [vmem:[%s5548_s1 + $0xb4] sm:$0xf0]  ;;  %v2678_v47 = vld [vmem:[%s5548_s1 + $0x2b8] sm:$0xf0] }
  0x55   :  { %940 = vmatpush.bf16.msra.mxu0 %v2445_v2  ;;  %968 = vmatpush.bf16.msra.mxu2 %v2449_v4  ;;  %v2553_v2 = vor.u32 %v3491_v60, %v2550_v61  ;;  %v3487_v4 = vld [vmem:[%s5548_s1 + $0x174] sm:$0xf0]  ;;  %v2421_v48 = vor.u32 %v3463_v40, %v2420_v39  ;;  %v2390_v59 = vld [vmem:[%s5548_s1 + $0x78] sm:$0xf0]  ;;  %v2948_v39 = vld [vmem:[%s5550_s3 + $0xb0] sm:$0xf] }
  0x56   :  { %v3527_v43 = vld [vmem:[%s5548_s1 + $0x2b4] sm:$0xf0]  ;;  %v3515_v60 = vld [vmem:[%s5548_s1 + $0x25c] sm:$0xf] }
  0x57   :  { %954 = vmatpush.bf16.msra.mxu1 %v2701_v3  ;;  %982 = vmatpush.bf16.msra.mxu3 %v2705_v8  ;;  %v2516_v3 = vld [vmem:[%s5548_s1 + $0x158] sm:$0xf]  ;;  %v3483_v8 = vld [vmem:[%s5548_s1 + $0x15c] sm:$0xf] }
  0x58   :  { %v2517_v12 = vor.u32 %v3487_v4, %v2516_v3  ;;  %v2644_v54 = vld [vmem:[%s5548_s1 + $0x258] sm:$0xf]  ;;  %v2646_v61 = vld [vmem:[%s5548_s1 + $0x278] sm:$0xf0] }
  0x59   :  { %941 = vmatpush.bf16.msra.mxu0 %v2413_v14  ;;  %969 = vmatpush.bf16.msra.mxu2 %v2417_v16  ;;  %v2521_v14 = vor.u32 %v3483_v8, %v2518_v9  ;;  %v3479_v16 = vld [vmem:[%s5548_s1 + $0x134] sm:$0xf0]  ;;  %v2649_v5 = vor.u32 %v3515_v60, %v2646_v61  ;;  %v2358_v7 = vld [vmem:[%s5548_s1 + $0x38] sm:$0xf0]  ;;  %v2860_v60 = vld [vmem:[%s5550_s3] sm:$0xf] }
  0x5a   :  { %v3519_v57 = vld [vmem:[%s5548_s1 + $0x274] sm:$0xf0]  ;;  %v3507_v8 = vld [vmem:[%s5548_s1 + $0x21c] sm:$0xf]  ;;  %v3569_v61 = vld [vmem:[%s5550_s3 + $0x4] sm:$0xf0] }
  0x5b   :  { %955 = vmatpush.bf16.msra.mxu1 %v2669_v15  ;;  %983 = vmatpush.bf16.msra.mxu3 %v2673_v20  ;;  %v2484_v15 = vld [vmem:[%s5548_s1 + $0x118] sm:$0xf]  ;;  %v3475_v20 = vld [vmem:[%s5548_s1 + $0x11c] sm:$0xf] }
  0x5c   :  { %v2485_v24 = vor.u32 %v3479_v16, %v2484_v15  ;;  %v2356_v63 = vld [vmem:[%s5548_s1 + $0x18] sm:$0xf]  ;;  %v2614_v9 = vld [vmem:[%s5548_s1 + $0x238] sm:$0xf0] }
  0x5d   :  { %942 = vmatpush.bf16.msra.mxu0 %v2381_v26  ;;  %970 = vmatpush.bf16.msra.mxu2 %v2385_v30  ;;  %v2489_v26 = vor.u32 %v3475_v20, %v2486_v21  ;;  %v2745_v30 = vor.u32 %v3539_v22, %v2742_v23  ;;  %v2612_v3 = vld [vmem:[%s5548_s1 + $0x218] sm:$0xf]  ;;  %v2617_v17 = vor.u32 %v3507_v8, %v2614_v9  ;;  %v2908_v20 = vld [vmem:[%s5550_s3 + $0x60] sm:$0xf]  ;;  %v3581_v21 = vld [vmem:[%s5550_s3 + $0x64] sm:$0xf0] }
  0x5e   :  { %v3511_v4 = vld [vmem:[%s5548_s1 + $0x234] sm:$0xf0]  ;;  %v2909_v22 = vor.u32 %v3581_v21, %v2908_v20  ;;  %v2972_v23 = vld [vmem:[%s5550_s3 + $0xe0] sm:$0xf]  ;;  %v3108_v9 = vld [vmem:[%s5550_s3 + $0x1f0] sm:$0xf] }
  0x5f   :  { %956 = vmatpush.bf16.msra.mxu1 %v2637_v29  ;;  %984 = vmatpush.bf16.msra.mxu3 %v2641_v34  ;;  %v2708_v29 = vld [vmem:[%s5548_s1 + $0x2d8] sm:$0xf]  ;;  %v3531_v34 = vld [vmem:[%s5548_s1 + $0x2dc] sm:$0xf]  ;;  %v2613_v15 = vor.u32 %v3511_v4, %v2612_v3  ;;  %v3036_v3 = vld [vmem:[%s5550_s3 + $0x160] sm:$0xf] }
  0x60   :  { %v2709_v37 = vor.u32 %v3535_v31, %v2708_v29  ;;  %v2713_v42 = vor.u32 %v3531_v34, %v2710_v35  ;;  %v3583_v11 = vld [vmem:[%s5550_s3 + $0x74] sm:$0xf0]  ;;  %v3577_v31 = vld [vmem:[%s5550_s3 + $0x44] sm:$0xf0] }
  0x61   :  { %943 = vmatpush.bf16.msra.mxu0 %v2349_v41  ;;  %971 = vmatpush.bf16.msra.mxu2 %v2353_v46  ;;  %v2676_v41 = vld [vmem:[%s5548_s1 + $0x298] sm:$0xf]  ;;  %v3523_v46 = vld [vmem:[%s5548_s1 + $0x29c] sm:$0xf]  ;;  %v3593_v34 = vld [vmem:[%s5550_s3 + $0xc4] sm:$0xf0] }
  0x62   :  { %v2681_v56 = vor.u32 %v3523_v46, %v2678_v47  ;;  %v3595_v28 = vld [vmem:[%s5550_s3 + $0xd4] sm:$0xf0]  ;;  %v2957_v35 = vor.u32 %v3593_v34, %v2956_v33  ;;  %v3589_v46 = vld [vmem:[%s5550_s3 + $0xa4] sm:$0xf0] }
  0x63   :  { %957 = vmatpush.bf16.msra.mxu1 %v2605_v45  ;;  %985 = vmatpush.bf16.msra.mxu3 %v2609_v49  ;;  %v2422_v45 = vld [vmem:[%s5548_s1 + $0xb8] sm:$0xf0]  ;;  %v2677_v49 = vor.u32 %v3527_v43, %v2676_v41  ;;  %v3591_v40 = vld [vmem:[%s5550_s3 + $0xb4] sm:$0xf0]  ;;  %v3573_v43 = vld [vmem:[%s5550_s3 + $0x24] sm:$0xf0] }
  0x64   :  { %944 = vmatmul.bf16.vlgmr.msra.gmra.mxu0 %v4030_v51  ;;  %972 = vmatmul.bf16.vlgmr.msra.gmra.mxu2 %v4030_v51  ;;  %v2949_v41 = vor.u32 %v3591_v40, %v2948_v39  ;;  %v3613_v4 = vld [vmem:[%s5550_s3 + $0x164] sm:$0xf0]  ;;  %v3092_v40 = vld [vmem:[%s5550_s3 + $0x1d0] sm:$0xf] }
  0x65   :  { %992 = vmatpush.bf16.msrb.mxu0 %v2581_v50  ;;  %1020 = vmatpush.bf16.msrb.mxu2 %v2585_v53  ;;  %v2425_v50 = vor.u32 %v3459_v44, %v2422_v45  ;;  %v3455_v53 = vld [vmem:[%s5548_s1 + $0x74] sm:$0xf0]  ;;  %v2940_v45 = vld [vmem:[%s5550_s3 + $0xa0] sm:$0xf] }
  0x66   :  { %958 = vmatmul.bf16.vlgmr.msra.gmra.mxu1 %v4041_v55  ;;  %986 = vmatmul.bf16.vlgmr.msra.gmra.mxu3 %v4041_v55  ;;  %v2941_v47 = vor.u32 %v3589_v46, %v2940_v45  ;;  %v3148_v45 = vld [vmem:[%s5550_s3 + $0x240] sm:$0xf]  ;;  %v3641_v46 = vld [vmem:[%s5550_s3 + $0x244] sm:$0xf0] }
  0x67   :  { %1006 = vmatpush.bf16.msrb.mxu1 %v2837_v52  ;;  %1034 = vmatpush.bf16.msrb.mxu3 %v2841_v58  ;;  %v2388_v52 = vld [vmem:[%s5548_s1 + $0x58] sm:$0xf]  ;;  %v3451_v58 = vld [vmem:[%s5548_s1 + $0x5c] sm:$0xf] }
  0x68   :  { %v2389_v62 = vor.u32 %v3455_v53, %v2388_v52  ;;  %v3044_v52 = vld [vmem:[%s5550_s3 + $0x170] sm:$0xf]  ;;  %v3615_v53 = vld [vmem:[%s5550_s3 + $0x174] sm:$0xf0] }
  0x69   :  { %993 = vmatpush.bf16.msrb.mxu0 %v2549_v0  ;;  %1021 = vmatpush.bf16.msrb.mxu2 %v2553_v2  ;;  %v2645_v0 = vor.u32 %v3519_v57, %v2644_v54  ;;  %v3447_v2 = vld [vmem:[%s5548_s1 + $0x34] sm:$0xf0]  ;;  %v4680_v54 = vld [vmem:[%s5551_s2] sm:$0xff]  ;;  %v2932_v57 = vld [vmem:[%s5550_s3 + $0x90] sm:$0xf] }
  0x6a   :  { %v159_v20 = vperm.slane %v4680_v54, 1 }
  0x6b   :  { %1007 = vmatpush.bf16.msrb.mxu1 %v2805_v1  ;;  %1035 = vmatpush.bf16.msrb.mxu3 %v2809_v6  ;;  %v2393_v1 = vor.u32 %v3451_v58, %v2390_v59  ;;  %v3443_v6 = vld [vmem:[%s5548_s1 + $0x1c] sm:$0xf]  ;;  %v3587_v58 = vld [vmem:[%s5550_s3 + $0x94] sm:$0xf0] }
  0x6c   :  { %v2361_v16 = vor.u32 %v3443_v6, %v2358_v7  ;;  %v2933_v59 = vor.u32 %v3587_v58, %v2932_v57  ;;  %v2924_v6 = vld [vmem:[%s5550_s3 + $0x80] sm:$0xf]  ;;  %v3585_v7 = vld [vmem:[%s5550_s3 + $0x84] sm:$0xf0]  ;;  %v3220_v57 = vld [vmem:[%s5550_s3 + $0x2d0] sm:$0xf] }
  0x6d   :  { %994 = vmatpush.bf16.msrb.mxu0 %v2517_v12  ;;  %1022 = vmatpush.bf16.msrb.mxu2 %v2521_v14  ;;  %v2357_v12 = vor.u32 %v3447_v2, %v2356_v63  ;;  %v3599_v14 = vld [vmem:[%s5550_s3 + $0xf4] sm:$0xf0]  ;;  %v3172_v63 = vld [vmem:[%s5550_s3 + $0x270] sm:$0xf]  ;;  %v2925_v8 = vor.u32 %v3585_v7, %v2924_v6 }
  0x6f   :  { %1008 = vmatpush.bf16.msrb.mxu1 %v2773_v13  ;;  %1036 = vmatpush.bf16.msrb.mxu3 %v2777_v18  ;;  %v2980_v13 = vld [vmem:[%s5550_s3 + $0xf0] sm:$0xf]  ;;  %v2917_v18 = vor.u32 %v3583_v11, %v2916_v10  ;;  %v3631_v10 = vld [vmem:[%s5550_s3 + $0x1f4] sm:$0xf0] }
  0x70   :  { %v2981_v19 = vor.u32 %v3599_v14, %v2980_v13  ;;  %v3164_v13 = vld [vmem:[%s5550_s3 + $0x260] sm:$0xf]  ;;  %v3645_v14 = vld [vmem:[%s5550_s3 + $0x264] sm:$0xf0] }
  0x71   :  { %995 = vmatpush.bf16.msrb.mxu0 %v2485_v24  ;;  %1023 = vmatpush.bf16.msrb.mxu2 %v2489_v26  ;;  %v3597_v24 = vld [vmem:[%s5550_s3 + $0xe4] sm:$0xf0]  ;;  %v2900_v26 = vld [vmem:[%s5550_s3 + $0x50] sm:$0xf] }
  0x73   :  { %1009 = vmatpush.bf16.msrb.mxu1 %v2741_v25  ;;  %1037 = vmatpush.bf16.msrb.mxu3 %v2745_v30  ;;  %v2973_v25 = vor.u32 %v3597_v24, %v2972_v23  ;;  %v2892_v30 = vld [vmem:[%s5550_s3 + $0x40] sm:$0xf]  ;;  %v3663_v23 = vld [vmem:[%s5550_s3 + $0x2f4] sm:$0xf0] }
  0x74   :  { %v2893_v32 = vor.u32 %v3577_v31, %v2892_v30 }
  0x75   :  { %996 = vmatpush.bf16.msrb.mxu0 %v2453_v36  ;;  %1024 = vmatpush.bf16.msrb.mxu2 %v2457_v38  ;;  %v2884_v36 = vld [vmem:[%s5550_s3 + $0x30] sm:$0xf] }
  0x77   :  { %1010 = vmatpush.bf16.msrb.mxu1 %v2709_v37  ;;  %1038 = vmatpush.bf16.msrb.mxu3 %v2713_v42  ;;  %v3575_v37 = vld [vmem:[%s5550_s3 + $0x34] sm:$0xf0]  ;;  %v2876_v42 = vld [vmem:[%s5550_s3 + $0x20] sm:$0xf] }
  0x78   :  { %v2885_v38 = vor.u32 %v3575_v37, %v2884_v36  ;;  %v2877_v44 = vor.u32 %v3573_v43, %v2876_v42  ;;  %v3228_v36 = vld [vmem:[%s5550_s3 + $0x2e0] sm:$0xf]  ;;  %v3661_v37 = vld [vmem:[%s5550_s3 + $0x2e4] sm:$0xf0] }
  0x79   :  { %997 = vmatpush.bf16.msrb.mxu0 %v2421_v48  ;;  %1025 = vmatpush.bf16.msrb.mxu2 %v2425_v50  ;;  %v2868_v48 = vld [vmem:[%s5550_s3 + $0x10] sm:$0xf]  ;;  %v3229_v39 = vor.u32 %v3661_v37, %v3228_v36  ;;  %v2988_v36 = vld [vmem:[%s5550_s3 + $0x100] sm:$0xf]  ;;  %v3601_v37 = vld [vmem:[%s5550_s3 + $0x104] sm:$0xf0] }
  0x7b   :  { %1011 = vmatpush.bf16.msrb.mxu1 %v2677_v49  ;;  %1039 = vmatpush.bf16.msrb.mxu3 %v2681_v56  ;;  %v3571_v49 = vld [vmem:[%s5550_s3 + $0x14] sm:$0xf0]  ;;  %v3045_v56 = vor.u32 %v3615_v53, %v3044_v52 }
  0x7c   :  { %v2869_v50 = vor.u32 %v3571_v49, %v2868_v48  ;;  %v3149_v49 = vor.u32 %v3641_v46, %v3148_v45  ;;  %v3607_v52 = vld [vmem:[%s5550_s3 + $0x134] sm:$0xf0]  ;;  %v160_v45 = vperm.slane %v4680_v54, 2 }
  0x7d   :  { %998 = vmatpush.bf16.msrb.mxu0 %v2389_v62  ;;  %1026 = vmatpush.bf16.msrb.mxu2 %v2393_v1  ;;  %v2861_v62 = vor.u32 %v3569_v61, %v2860_v60  ;;  %v158_v1 = vperm.slane %v4680_v54, 0  ;;  %v3084_v60 = vld [vmem:[%s5550_s3 + $0x1c0] sm:$0xf]  ;;  %v3625_v61 = vld [vmem:[%s5550_s3 + $0x1c4] sm:$0xf0] }
  0x7f   :  { %1012 = vmatpush.bf16.msrb.mxu1 %v2645_v0  ;;  %1040 = vmatpush.bf16.msrb.mxu3 %v2649_v5  ;;  %v3647_v0 = vld [vmem:[%s5550_s3 + $0x274] sm:$0xf0]  ;;  %v3037_v5 = vor.u32 %v3613_v4, %v3036_v3 }
  0x80   :  { %v3173_v2 = vor.u32 %v3647_v0, %v3172_v63  ;;  %v3085_v63 = vor.u32 %v3625_v61, %v3084_v60  ;;  %v3140_v0 = vld [vmem:[%s5550_s3 + $0x230] sm:$0xf] }
  0x81   :  { %999 = vmatpush.bf16.msrb.mxu0 %v2357_v12  ;;  %1027 = vmatpush.bf16.msrb.mxu2 %v2361_v16  ;;  %v3109_v12 = vor.u32 %v3631_v10, %v3108_v9  ;;  %v3212_v9 = vld [vmem:[%s5550_s3 + $0x2c0] sm:$0xf] }
  0x83   :  { %1013 = vmatpush.bf16.msrb.mxu1 %v2613_v15  ;;  %1041 = vmatpush.bf16.msrb.mxu3 %v2617_v17  ;;  %v3165_v17 = vor.u32 %v3645_v14, %v3164_v13  ;;  %v3076_v13 = vld [vmem:[%s5550_s3 + $0x1b0] sm:$0xf]  ;;  %v3623_v14 = vld [vmem:[%s5550_s3 + $0x1b4] sm:$0xf0] }
  0x84   :  { %1000 = vmatmul.bf16.vlgmr.msrb.gmra.mxu0 %v4030_v51  ;;  %1028 = vmatmul.bf16.vlgmr.msrb.gmra.mxu2 %v4030_v51  ;;  %v3579_v51 = vld [vmem:[%s5550_s3 + $0x54] sm:$0xf0] }
  0x85   :  { %1910 = vmatpush.bf16.msra.mxu0 %v2917_v18  ;;  %v2901_v27 = vor.u32 %v3579_v51, %v2900_v26  ;;  %1938 = vmatpush.bf16.msra.mxu2 %v3045_v56  ;;  %v3028_v18 = vld [vmem:[%s5550_s3 + $0x150] sm:$0xf]  ;;  %v3100_v26 = vld [vmem:[%s5550_s3 + $0x1e0] sm:$0xf]  ;;  %v3629_v51 = vld [vmem:[%s5550_s3 + $0x1e4] sm:$0xf0] }
  0x86   :  { %1014 = vmatmul.bf16.vlgmr.msrb.gmra.mxu1 %v4041_v55  ;;  %1042 = vmatmul.bf16.vlgmr.msrb.gmra.mxu3 %v4041_v55  ;;  %v2964_v55 = vld [vmem:[%s5550_s3 + $0xd0] sm:$0xf] }
  0x87   :  { %1924 = vmatpush.bf16.msra.mxu1 %v2981_v19  ;;  %v2965_v29 = vor.u32 %v3595_v28, %v2964_v55  ;;  %v3611_v19 = vld [vmem:[%s5550_s3 + $0x154] sm:$0xf0]  ;;  %1952 = vmatpush.bf16.msra.mxu3 %v3109_v12  ;;  %v3156_v55 = vld [vmem:[%s5550_s3 + $0x250] sm:$0xf]  ;;  %v3657_v12 = vld [vmem:[%s5550_s3 + $0x2c4] sm:$0xf0] }
  0x88   :  { %v3029_v21 = vor.u32 %v3611_v19, %v3028_v18  ;;  %v3643_v28 = vld [vmem:[%s5550_s3 + $0x254] sm:$0xf0]  ;;  %v3132_v18 = vld [vmem:[%s5550_s3 + $0x220] sm:$0xf]  ;;  %v3637_v19 = vld [vmem:[%s5550_s3 + $0x224] sm:$0xf0] }
  0x89   :  { %1911 = vmatpush.bf16.msra.mxu0 %v2909_v22  ;;  %1939 = vmatpush.bf16.msra.mxu2 %v3037_v5  ;;  %v3236_v22 = vld [vmem:[%s5550_s3 + $0x2f0] sm:$0xf]  ;;  %v3157_v31 = vor.u32 %v3643_v28, %v3156_v55  ;;  %v3004_v5 = vld [vmem:[%s5550_s3 + $0x120] sm:$0xf] }
  0x8a   :  { %v3068_v55 = vld [vmem:[%s5550_s3 + $0x1a0] sm:$0xf] }
  0x8b   :  { %1925 = vmatpush.bf16.msra.mxu1 %v2973_v25  ;;  %v3237_v25 = vor.u32 %v3663_v23, %v3236_v22  ;;  %v3603_v22 = vld [vmem:[%s5550_s3 + $0x114] sm:$0xf0] }
  0x8d   :  { %1912 = vmatpush.bf16.msra.mxu0 %v2901_v27  ;;  %1940 = vmatpush.bf16.msra.mxu2 %v3029_v21  ;;  %v3101_v27 = vor.u32 %v3629_v51, %v3100_v26  ;;  %v2996_v21 = vld [vmem:[%s5550_s3 + $0x110] sm:$0xf] }
  0x8e   :  { %v2997_v26 = vor.u32 %v3603_v22, %v2996_v21  ;;  %v3204_v51 = vld [vmem:[%s5550_s3 + $0x2b0] sm:$0xf]  ;;  %v3695_v21 = vld [vmem:[%s5550_s3 + $0x3f4] sm:$0xf0] }
  0x8f   :  { %1926 = vmatpush.bf16.msra.mxu1 %v2965_v29  ;;  %1953 = vmatpush.bf16.msra.mxu3 %v3101_v27  ;;  %v3655_v27 = vld [vmem:[%s5550_s3 + $0x2b4] sm:$0xf0] }
  0x91   :  { %1913 = vmatpush.bf16.msra.mxu0 %v2893_v32  ;;  %v3020_v32 = vld [vmem:[%s5550_s3 + $0x140] sm:$0xf] }
  0x93   :  { %1927 = vmatpush.bf16.msra.mxu1 %v2957_v35  ;;  %v3609_v35 = vld [vmem:[%s5550_s3 + $0x144] sm:$0xf0] }
  0x95   :  { %1914 = vmatpush.bf16.msra.mxu0 %v2885_v38  ;;  %v3021_v38 = vor.u32 %v3609_v35, %v3020_v32  ;;  %v3635_v32 = vld [vmem:[%s5550_s3 + $0x214] sm:$0xf0] }
  0x97   :  { %1928 = vmatpush.bf16.msra.mxu1 %v2949_v41  ;;  %v3627_v41 = vld [vmem:[%s5550_s3 + $0x1d4] sm:$0xf0]  ;;  %1941 = vmatpush.bf16.msra.mxu2 %v3021_v38 }
  0x99   :  { %1915 = vmatpush.bf16.msra.mxu0 %v2877_v44  ;;  %v3093_v44 = vor.u32 %v3627_v41, %v3092_v40  ;;  %v2989_v40 = vor.u32 %v3601_v37, %v2988_v36  ;;  %v3196_v41 = vld [vmem:[%s5550_s3 + $0x2a0] sm:$0xf]  ;;  %v3693_v36 = vld [vmem:[%s5550_s3 + $0x3e4] sm:$0xf0]  ;;  %v3596_v37 = vld [vmem:[%s5550_s3 + $0xe4] sm:$0xf] }
  0x9b   :  { %1929 = vmatpush.bf16.msra.mxu1 %v2941_v47  ;;  %1954 = vmatpush.bf16.msra.mxu3 %v3093_v44 }
  0x9d   :  { %1916 = vmatpush.bf16.msra.mxu0 %v2869_v50  ;;  %v3012_v50 = vld [vmem:[%s5550_s3 + $0x130] sm:$0xf] }
  0x9e   :  { %v3013_v56 = vor.u32 %v3607_v52, %v3012_v50  ;;  %v3116_v50 = vld [vmem:[%s5550_s3 + $0x200] sm:$0xf]  ;;  %v3633_v52 = vld [vmem:[%s5550_s3 + $0x204] sm:$0xf0] }
  0x9f   :  { %1930 = vmatpush.bf16.msra.mxu1 %v2933_v59  ;;  %v3659_v59 = vld [vmem:[%s5550_s3 + $0x2d4] sm:$0xf0]  ;;  %1955 = vmatpush.bf16.msra.mxu3 %v3085_v63  ;;  %v3188_v63 = vld [vmem:[%s5550_s3 + $0x290] sm:$0xf] }
  0xa0   :  { %1942 = vmatpush.bf16.msra.mxu2 %v3013_v56  ;;  %v3117_v56 = vor.u32 %v3633_v52, %v3116_v50 }
  0xa1   :  { %1917 = vmatpush.bf16.msra.mxu0 %v2861_v62  ;;  %v833_v11 = vpop.f32.mrf.mxu0  ;;  %v3221_v62 = vor.u32 %v3659_v59, %v3220_v57  ;;  %v3300_v57 = vld [vmem:[%s5550_s3 + $0x370] sm:$0xf]  ;;  %v3582_v59 = vld [vmem:[%s5550_s3 + $0x74] sm:$0xf] }
  0xa2   :  { %v834_v15 = vadd.f32 %v833_v11, %v158_v1 }
  0xa3   :  { %v847_v16 = vpop.f32.mrf.mxu1  ;;  %1931 = vmatpush.bf16.msra.mxu1 %v2925_v8  ;;  %v3605_v8 = vld [vmem:[%s5550_s3 + $0x124] sm:$0xf0] }
  0xa4   :  { %v4738_v24 = vadd.f32 %v847_v16, %v834_v15  ;;  %v3005_v11 = vor.u32 %v3605_v8, %v3004_v5  ;;  %v3213_v16 = vor.u32 %v3657_v12, %v3212_v9  ;;  %v3052_v5 = vld [vmem:[%s5550_s3 + $0x180] sm:$0xf] }
  0xa5   :  { %1966 = vmatpush.bf16.msrb.mxu0 %v3173_v2  ;;  %v3292_v9 = vld [vmem:[%s5550_s3 + $0x360] sm:$0xf] }
  0xa6   :  { %v1064_v29 = vmul.f32 1.442695, %v4738_v24  ;;  %1943 = vmatpush.bf16.msra.mxu2 %v3005_v11  ;;  %vm1048_vm0 = vcmp.gt.f32.partialorder %v4738_v24, 0.0 }
  0xa7   :  { %v861_v30 = vpop.f32.mrf.mxu2  ;;  %1980 = vmatpush.bf16.msrb.mxu1 %v3237_v25 }
  0xa8   :  { %v862_v33 = vadd.f32 %v861_v30, %v159_v20  ;;  %3713 = vpow2.f32 %v1064_v29  ;;  %v3205_v29 = vor.u32 %v3655_v27, %v3204_v51  ;;  %v3621_v30 = vld [vmem:[%s5550_s3 + $0x1a4] sm:$0xf0]  ;;  %v3598_v51 = vld [vmem:[%s5550_s3 + $0xf4] sm:$0xf]  ;;  %v2982_v27 = vld [vmem:[%s5550_s3 + $0xf8] sm:$0xf0] }
  0xa9   :  { %1967 = vmatpush.bf16.msrb.mxu0 %v3165_v17  ;;  %v875_v34 = vpop.f32.mrf.mxu3  ;;  %v835_v43 = vpop.f32.mrf.mxu0  ;;  %v3077_v17 = vor.u32 %v3623_v14, %v3076_v13 }
  0xaa   :  { %v4771_v42 = vadd.f32 %v875_v34, %v862_v33  ;;  %v836_v47 = vadd.f32 %v835_v43, %v158_v1  ;;  %v3639_v1 = vld [vmem:[%s5550_s3 + $0x234] sm:$0xf0]  ;;  %1944 = vmatpush.bf16.msra.mxu2 %v2997_v26  ;;  %v3069_v34 = vor.u32 %v3621_v30, %v3068_v55  ;;  %v3653_v43 = vld [vmem:[%s5550_s3 + $0x2a4] sm:$0xf0]  ;;  %v2985_v55 = vor.u32 %v3598_v51, %v2982_v27  ;;  %v3578_v30 = vld [vmem:[%s5550_s3 + $0x54] sm:$0xf] }
  0xab   :  { %v849_v48 = vpop.f32.mrf.mxu1  ;;  %1981 = vmatpush.bf16.msrb.mxu1 %v3229_v39  ;;  %v3141_v4 = vor.u32 %v3639_v1, %v3140_v0  ;;  %1956 = vmatpush.bf16.msra.mxu3 %v3077_v17  ;;  %v3197_v46 = vor.u32 %v3653_v43, %v3196_v41  ;;  %v3651_v0 = vld [vmem:[%s5550_s3 + $0x294] sm:$0xf0]  ;;  %v3180_v17 = vld [vmem:[%s5550_s3 + $0x280] sm:$0xf] }
  0xac   :  { %v1066_v53 = vmul.f32 1.442695, %v4771_v42  ;;  %v4789_v58 = vadd.f32 %v849_v48, %v836_v47  ;;  %v3619_v47 = vld [vmem:[%s5550_s3 + $0x194] sm:$0xf0]  ;;  %vm1049_vm2 = vcmp.gt.f32.partialorder %v4771_v42, 0.0 }
  0xad   :  { %1968 = vmatpush.bf16.msrb.mxu0 %v3157_v31  ;;  %v3124_v31 = vld [vmem:[%s5550_s3 + $0x210] sm:$0xf] }
  0xae   :  { %v1080_v2 = vmul.f32 1.442695, %v4789_v58  ;;  %3715 = vpow2.f32 %v1066_v53  ;;  %v3714_v10 = vpop.eup %3713  ;;  %vm1056_vm1 = vcmp.gt.f32.partialorder %v4789_v58, 0.0  ;;  %v3125_v35 = vor.u32 %v3635_v32, %v3124_v31  ;;  %1945 = vmatpush.bf16.msra.mxu2 %v2989_v40  ;;  %v2974_v40 = vld [vmem:[%s5550_s3 + $0xe8] sm:$0xf0] }
  0xaf   :  { %v863_v3 = vpop.f32.mrf.mxu2  ;;  %1982 = vmatpush.bf16.msrb.mxu1 %v3221_v62  ;;  %v2842_v23 = vadd.f32 -1.0, %v3714_v10  ;;  %1957 = vmatpush.bf16.msra.mxu3 %v3069_v34  ;;  %v2918_v62 = vld [vmem:[%s5550_s3 + $0x78] sm:$0xf0]  ;;  %v3677_v10 = vld [vmem:[%s5550_s3 + $0x364] sm:$0xf0] }
  0xb0   :  { %v864_v6 = vadd.f32 %v863_v3, %v159_v20  ;;  %3717 = vpow2.f32 %v1080_v2  ;;  %v3133_v20 = vor.u32 %v3637_v19, %v3132_v18  ;;  %v2921_v3 = vor.u32 %v3582_v59, %v2918_v62  ;;  %v3649_v19 = vld [vmem:[%s5550_s3 + $0x284] sm:$0xf0]  ;;  %v3348_v59 = vld [vmem:[%s5550_s3 + $0x3d0] sm:$0xf] }
  0xb1   :  { %1969 = vmatpush.bf16.msrb.mxu0 %v3149_v49  ;;  %v877_v7 = vpop.f32.mrf.mxu3  ;;  %v1112_v38 = vsel %vm1048_vm0, %v4738_v24, %v2842_v23  ;;  %v3060_v24 = vld [vmem:[%s5550_s3 + $0x190] sm:$0xf]  ;;  %v3293_v14 = vor.u32 %v3677_v10, %v3292_v9  ;;  %v161_v23 = vperm.slane %v4680_v54, 3  ;;  %v3340_v10 = vld [vmem:[%s5550_s3 + $0x3c0] sm:$0xf] }
  0xb2   :  { %v4825_v15 = vadd.f32 %v877_v7, %v864_v6  ;;  %v3061_v49 = vor.u32 %v3619_v47, %v3060_v24  ;;  %v3617_v6 = vld [vmem:[%s5550_s3 + $0x184] sm:$0xf0]  ;;  %v3276_v24 = vld [vmem:[%s5550_s3 + $0x340] sm:$0xf] }
  0xb3   :  { %1983 = vmatpush.bf16.msrb.mxu1 %v3213_v16  ;;  %v3053_v7 = vor.u32 %v3617_v6, %v3052_v5  ;;  %v2910_v16 = vld [vmem:[%s5550_s3 + $0x68] sm:$0xf0]  ;;  %v3673_v47 = vld [vmem:[%s5550_s3 + $0x344] sm:$0xf0] }
  0xb4   :  { %v1082_v25 = vmul.f32 1.442695, %v4825_v15  ;;  %v3716_v28 = vpop.eup %3715  ;;  %vm1057_vm3 = vcmp.gt.f32.partialorder %v4825_v15, 0.0  ;;  %1958 = vmatpush.bf16.msra.mxu3 %v3061_v49  ;;  %v3277_v52 = vor.u32 %v3673_v47, %v3276_v24  ;;  %v3685_v24 = vld [vmem:[%s5550_s3 + $0x3a4] sm:$0xf0] }
  0xb5   :  { %1970 = vmatpush.bf16.msrb.mxu0 %v3141_v4  ;;  %v2843_v44 = vadd.f32 -1.0, %v3716_v28  ;;  %v3189_v4 = vor.u32 %v3651_v0, %v3188_v63  ;;  %v3284_v28 = vld [vmem:[%s5550_s3 + $0x350] sm:$0xf]  ;;  %v2966_v63 = vld [vmem:[%s5550_s3 + $0xd8] sm:$0xf0] }
  0xb6   :  { %3719 = vpow2.f32 %v1082_v25  ;;  %v3718_v33 = vpop.eup %3717  ;;  %v3181_v25 = vor.u32 %v3649_v19, %v3180_v17  ;;  %v2958_v17 = vld [vmem:[%s5550_s3 + $0xc8] sm:$0xf0]  ;;  %v3669_v19 = vld [vmem:[%s5550_s3 + $0x324] sm:$0xf0]  ;;  %v3588_v47 = vld [vmem:[%s5550_s3 + $0xa4] sm:$0xf] }
  0xb7   :  { %v2850_v39 = vadd.f32 -1.0, %v3718_v33  ;;  %1984 = vmatpush.bf16.msrb.mxu1 %v3205_v29  ;;  %v1113_v1 = vsel %vm1049_vm2, %v4771_v42, %v2843_v44  ;;  %v3675_v29 = vld [vmem:[%s5550_s3 + $0x354] sm:$0xf0]  ;;  %v2902_v33 = vld [vmem:[%s5550_s3 + $0x58] sm:$0xf0] }
  0xb8   :  { %1959 = vmatpush.bf16.msra.mxu3 %v3053_v7  ;;  %v3285_v32 = vor.u32 %v3675_v29, %v3284_v28  ;;  %v2905_v34 = vor.u32 %v3578_v30, %v2902_v33  ;;  %v3574_v7 = vld [vmem:[%s5550_s3 + $0x34] sm:$0xf]  ;;  %v3687_v28 = vld [vmem:[%s5550_s3 + $0x3b4] sm:$0xf0] }
  0xb9   :  { %1971 = vmatpush.bf16.msrb.mxu0 %v3133_v20  ;;  %v1120_v48 = vsel %vm1056_vm1, %v4789_v58, %v2850_v39  ;;  %v3679_v58 = vld [vmem:[%s5550_s3 + $0x374] sm:$0xf0]  ;;  %v3364_v20 = vld [vmem:[%s5550_s3 + $0x3f0] sm:$0xf]  ;;  %v3590_v29 = vld [vmem:[%s5550_s3 + $0xb4] sm:$0xf] }
  0xba   :  { %v4893_v53 = vpack.c.bf16 %v1120_v48, %v1112_v38  ;;  %v3301_v61 = vor.u32 %v3679_v58, %v3300_v57  ;;  %v3365_v26 = vor.u32 %v3695_v21, %v3364_v20  ;;  %v3576_v48 = vld [vmem:[%s5550_s3 + $0x44] sm:$0xf] }
  0xbb   :  { %1985 = vmatpush.bf16.msrb.mxu1 %v3197_v46  ;;  %v2977_v46 = vor.u32 %v3596_v37, %v2974_v40 }
  0xbc   :  { %v3720_v60 = vpop.eup %3719  ;;  %1918 = vmatmul.bf16.vlgmr.msra.gmra.mxu0 %v4893_v53  ;;  %1994 = vmatpush.bf16.msrb.mxu2 %v3301_v61 }
  0xbd   :  { %1972 = vmatpush.bf16.msrb.mxu0 %v3125_v35  ;;  %v2851_v2 = vadd.f32 -1.0, %v3720_v60  ;;  %2008 = vmatpush.bf16.msrb.mxu3 %v3365_v26  ;;  %v3356_v35 = vld [vmem:[%s5550_s3 + $0x3e0] sm:$0xf]  ;;  %v3691_v60 = vld [vmem:[%s5550_s3 + $0x3d4] sm:$0xf0] }
  0xbe   :  { %v3357_v39 = vor.u32 %v3693_v36, %v3356_v35  ;;  %v3349_v62 = vor.u32 %v3691_v60, %v3348_v59  ;;  %v2878_v26 = vld [vmem:[%s5550_s3 + $0x28] sm:$0xf0]  ;;  %v3252_v35 = vld [vmem:[%s5550_s3 + $0x310] sm:$0xf]  ;;  %v3568_v59 = vld [vmem:[%s5550_s3 + $0x4] sm:$0xf] }
  0xbf   :  { %v1121_v42 = vsel %vm1057_vm3, %v4825_v15, %v2851_v2  ;;  %1986 = vmatpush.bf16.msrb.mxu1 %v3189_v4  ;;  %v3580_v15 = vld [vmem:[%s5550_s3 + $0x64] sm:$0xf]  ;;  %v3268_v2 = vld [vmem:[%s5550_s3 + $0x330] sm:$0xf]  ;;  %v3671_v4 = vld [vmem:[%s5550_s3 + $0x334] sm:$0xf0] }
  0xc0   :  { %v4932_v11 = vpack.c.bf16 %v1121_v42, %v1113_v1  ;;  %v2913_v18 = vor.u32 %v3580_v15, %v2910_v16  ;;  %1995 = vmatpush.bf16.msrb.mxu2 %v3293_v14  ;;  %v3269_v6 = vor.u32 %v3671_v4, %v3268_v2  ;;  %v2886_v42 = vld [vmem:[%s5550_s3 + $0x38] sm:$0xf0]  ;;  %v3683_v4 = vld [vmem:[%s5550_s3 + $0x394] sm:$0xf0] }
  0xc1   :  { %1973 = vmatpush.bf16.msrb.mxu0 %v3117_v56  ;;  %v889_v8 = vpop.f32.mrf.mxu0  ;;  %2009 = vmatpush.bf16.msrb.mxu3 %v3357_v39  ;;  %v2894_v56 = vld [vmem:[%s5550_s3 + $0x48] sm:$0xf0]  ;;  %v2889_v9 = vor.u32 %v3574_v7, %v2886_v42  ;;  %v3570_v39 = vld [vmem:[%s5550_s3 + $0x14] sm:$0xf] }
  0xc2   :  { %v890_v12 = vadd.f32 %v889_v8, %v160_v45  ;;  %1932 = vmatmul.bf16.vlgmr.msra.gmra.mxu1 %v4932_v11  ;;  %v2897_v58 = vor.u32 %v3576_v48, %v2894_v56  ;;  %v2942_v48 = vld [vmem:[%s5550_s3 + $0xa8] sm:$0xf0]  ;;  %v3244_v56 = vld [vmem:[%s5550_s3 + $0x300] sm:$0xf] }
  0xc3   :  { %v903_v13 = vpop.f32.mrf.mxu1  ;;  %1987 = vmatpush.bf16.msrb.mxu1 %v3181_v25  ;;  %v3572_v25 = vld [vmem:[%s5550_s3 + $0x24] sm:$0xf] }
  0xc4   :  { %v4954_v22 = vadd.f32 %v903_v13, %v890_v12  ;;  %1996 = vmatpush.bf16.msrb.mxu2 %v3285_v32  ;;  %v3689_v12 = vld [vmem:[%s5550_s3 + $0x3c4] sm:$0xf0]  ;;  %v3592_v13 = vld [vmem:[%s5550_s3 + $0xc4] sm:$0xf]  ;;  %v2881_v27 = vor.u32 %v3572_v25, %v2878_v26 }
  0xc5   :  { %2022 = vmatpush.bf16.msra.mxu0 %v2921_v3  ;;  %2010 = vmatpush.bf16.msrb.mxu3 %v3349_v62  ;;  %v3341_v16 = vor.u32 %v3689_v12, %v3340_v10  ;;  %v2961_v21 = vor.u32 %v3592_v13, %v2958_v17  ;;  %v3614_v62 = vld [vmem:[%s5550_s3 + $0x174] sm:$0xf]  ;;  %v3612_v12 = vld [vmem:[%s5550_s3 + $0x164] sm:$0xf]  ;;  %v3038_v13 = vld [vmem:[%s5550_s3 + $0x168] sm:$0xf0] }
  0xc6   :  { %v1068_v31 = vmul.f32 1.442695, %v4954_v22  ;;  %vm1050_vm4 = vcmp.gt.f32.partialorder %v4954_v22, 0.0 }
  0xc7   :  { %2036 = vmatpush.bf16.msra.mxu1 %v2985_v55  ;;  %v917_v38 = vpop.f32.mrf.mxu2  ;;  %v3332_v55 = vld [vmem:[%s5550_s3 + $0x3b0] sm:$0xf] }
  0xc8   :  { %3721 = vpow2.f32 %v1068_v31  ;;  %v918_v41 = vadd.f32 %v917_v38, %v161_v23  ;;  %1997 = vmatpush.bf16.msrb.mxu2 %v3277_v52  ;;  %v3333_v30 = vor.u32 %v3687_v28, %v3332_v55  ;;  %v2950_v31 = vld [vmem:[%s5550_s3 + $0xb8] sm:$0xf0]  ;;  %v3667_v38 = vld [vmem:[%s5550_s3 + $0x314] sm:$0xf0]  ;;  %v2945_v52 = vor.u32 %v3588_v47, %v2942_v48 }
  0xc9   :  { %2023 = vmatpush.bf16.msra.mxu0 %v2913_v18  ;;  %v891_v43 = vpop.f32.mrf.mxu0  ;;  %v931_v44 = vpop.f32.mrf.mxu3  ;;  %v3260_v18 = vld [vmem:[%s5550_s3 + $0x320] sm:$0xf]  ;;  %2011 = vmatpush.bf16.msrb.mxu3 %v3341_v16  ;;  %v3094_v47 = vld [vmem:[%s5550_s3 + $0x1d8] sm:$0xf0] }
  0xca   :  { %v892_v49 = vadd.f32 %v891_v43, %v160_v45  ;;  %v5005_v57 = vadd.f32 %v931_v44, %v918_v41  ;;  %v3594_v45 = vld [vmem:[%s5550_s3 + $0xd4] sm:$0xf]  ;;  %v3253_v43 = vor.u32 %v3667_v38, %v3252_v35  ;;  %v3324_v44 = vld [vmem:[%s5550_s3 + $0x3a0] sm:$0xf]  ;;  %v3608_v38 = vld [vmem:[%s5550_s3 + $0x144] sm:$0xf] }
  0xcb   :  { %v905_v50 = vpop.f32.mrf.mxu1  ;;  %2037 = vmatpush.bf16.msra.mxu1 %v2977_v46  ;;  %v2969_v1 = vor.u32 %v3594_v45, %v2966_v63  ;;  %v3046_v63 = vld [vmem:[%s5550_s3 + $0x178] sm:$0xf0]  ;;  %v3308_v16 = vld [vmem:[%s5550_s3 + $0x380] sm:$0xf] }
  0xcc   :  { %v5016_v61 = vadd.f32 %v905_v50, %v892_v49  ;;  %v1070_v0 = vmul.f32 1.442695, %v5005_v57  ;;  %1998 = vmatpush.bf16.msrb.mxu2 %v3269_v6  ;;  %v3325_v50 = vor.u32 %v3685_v24, %v3324_v44  ;;  %vm1051_vm6 = vcmp.gt.f32.partialorder %v5005_v57, 0.0  ;;  %v2934_v6 = vld [vmem:[%s5550_s3 + $0x98] sm:$0xf0] }
  0xcd   :  { %2024 = vmatpush.bf16.msra.mxu0 %v2905_v34  ;;  %v2953_v34 = vor.u32 %v3590_v29, %v2950_v31  ;;  %2012 = vmatpush.bf16.msrb.mxu3 %v3333_v30  ;;  %v3049_v2 = vor.u32 %v3614_v62, %v3046_v63  ;;  %v3610_v29 = vld [vmem:[%s5550_s3 + $0x154] sm:$0xf]  ;;  %v3030_v30 = vld [vmem:[%s5550_s3 + $0x158] sm:$0xf0]  ;;  %v163_v31 = vperm.slane %v4680_v54, 5 }
  0xce   :  { %v1084_v3 = vmul.f32 1.442695, %v5016_v61  ;;  %v3722_v5 = vpop.eup %3721  ;;  %3723 = vpow2.f32 %v1070_v0  ;;  %vm1058_vm5 = vcmp.gt.f32.partialorder %v5016_v61, 0.0  ;;  %v162_v0 = vperm.slane %v4680_v54, 4  ;;  %v3626_v24 = vld [vmem:[%s5550_s3 + $0x1d4] sm:$0xf] }
  0xcf   :  { %2038 = vmatpush.bf16.msra.mxu1 %v2969_v1  ;;  %v919_v8 = vpop.f32.mrf.mxu2  ;;  %v2844_v20 = vadd.f32 -1.0, %v3722_v5  ;;  %v3586_v5 = vld [vmem:[%s5550_s3 + $0x94] sm:$0xf]  ;;  %v3086_v62 = vld [vmem:[%s5550_s3 + $0x1c8] sm:$0xf0] }
  0xd0   :  { %3725 = vpow2.f32 %v1084_v3  ;;  %v920_v14 = vadd.f32 %v919_v8, %v161_v23  ;;  %v3261_v23 = vor.u32 %v3669_v19, %v3260_v18  ;;  %v3316_v3 = vld [vmem:[%s5550_s3 + $0x390] sm:$0xf]  ;;  %v2937_v8 = vor.u32 %v3586_v5, %v2934_v6  ;;  %v3681_v19 = vld [vmem:[%s5550_s3 + $0x384] sm:$0xf0] }
  0xd1   :  { %2025 = vmatpush.bf16.msra.mxu0 %v2897_v58  ;;  %v933_v15 = vpop.f32.mrf.mxu3  ;;  %v1114_v37 = vsel %vm1050_vm4, %v4954_v22, %v2844_v20  ;;  %v2870_v22 = vld [vmem:[%s5550_s3 + $0x18] sm:$0xf0]  ;;  %v3665_v58 = vld [vmem:[%s5550_s3 + $0x304] sm:$0xf0]  ;;  %2013 = vmatpush.bf16.msrb.mxu3 %v3325_v50  ;;  %v3317_v42 = vor.u32 %v3683_v4, %v3316_v3  ;;  %v3584_v20 = vld [vmem:[%s5550_s3 + $0x84] sm:$0xf]  ;;  %v3309_v25 = vor.u32 %v3681_v19, %v3308_v16 }
  0xd2   :  { %v5062_v51 = vadd.f32 %v933_v15, %v920_v14  ;;  %1999 = vmatpush.bf16.msrb.mxu2 %v3261_v23  ;;  %v2873_v46 = vor.u32 %v3570_v39, %v2870_v22  ;;  %v3245_v45 = vor.u32 %v3665_v58, %v3244_v56  ;;  %v3041_v15 = vor.u32 %v3612_v12, %v3038_v13  ;;  %v3022_v39 = vld [vmem:[%s5550_s3 + $0x148] sm:$0xf0]  ;;  %v3014_v56 = vld [vmem:[%s5550_s3 + $0x138] sm:$0xf0]  ;;  %v3602_v12 = vld [vmem:[%s5550_s3 + $0x114] sm:$0xf] }
  0xd3   :  { %2039 = vmatpush.bf16.msra.mxu1 %v2961_v21  ;;  %v2926_v21 = vld [vmem:[%s5550_s3 + $0x88] sm:$0xf0]  ;;  %v3025_v22 = vor.u32 %v3608_v38, %v3022_v39  ;;  %v2998_v13 = vld [vmem:[%s5550_s3 + $0x118] sm:$0xf0]  ;;  %v3662_v38 = vld [vmem:[%s5550_s3 + $0x2f4] sm:$0xf] }
  0xd4   :  { %v3724_v32 = vpop.eup %3723  ;;  %v1086_v33 = vmul.f32 1.442695, %v5062_v51  ;;  %vm1059_vm7 = vcmp.gt.f32.partialorder %v5062_v51, 0.0  ;;  %v2929_v26 = vor.u32 %v3584_v20, %v2926_v21  ;;  %v3174_v16 = vld [vmem:[%s5550_s3 + $0x278] sm:$0xf0] }
  0xd5   :  { %2026 = vmatpush.bf16.msra.mxu0 %v2889_v9  ;;  %v2845_v40 = vadd.f32 -1.0, %v3724_v32  ;;  %2014 = vmatpush.bf16.msrb.mxu3 %v3317_v42  ;;  %v3033_v32 = vor.u32 %v3610_v29, %v3030_v30  ;;  %v3078_v42 = vld [vmem:[%s5550_s3 + $0x1b8] sm:$0xf0]  ;;  %v3070_v19 = vld [vmem:[%s5550_s3 + $0x1a8] sm:$0xf0] }
  0xd6   :  { %v3726_v36 = vpop.eup %3725  ;;  %3727 = vpow2.f32 %v1086_v33  ;;  %2000 = vmatpush.bf16.msrb.mxu2 %v3253_v43  ;;  %v3628_v33 = vld [vmem:[%s5550_s3 + $0x1e4] sm:$0xf]  ;;  %v3238_v39 = vld [vmem:[%s5550_s3 + $0x2f8] sm:$0xf0] }
  0xd7   :  { %v2852_v41 = vadd.f32 -1.0, %v3726_v36  ;;  %2040 = vmatpush.bf16.msra.mxu1 %v2953_v34  ;;  %v1115_v9 = vsel %vm1051_vm6, %v5005_v57, %v2845_v40  ;;  %v3102_v34 = vld [vmem:[%s5550_s3 + $0x1e8] sm:$0xf0]  ;;  %v3644_v30 = vld [vmem:[%s5550_s3 + $0x264] sm:$0xf] }
  0xd9   :  { %2027 = vmatpush.bf16.msra.mxu0 %v2881_v27  ;;  %v1122_v49 = vsel %vm1058_vm5, %v5016_v61, %v2852_v41  ;;  %v2862_v61 = vld [vmem:[%s5550_s3 + $0x8] sm:$0xf0]  ;;  %v3110_v27 = vld [vmem:[%s5550_s3 + $0x1f8] sm:$0xf0]  ;;  %2015 = vmatpush.bf16.msrb.mxu3 %v3309_v25  ;;  %v3600_v25 = vld [vmem:[%s5550_s3 + $0x104] sm:$0xf] }
  0xda   :  { %v5117_v60 = vpack.c.bf16 %v1122_v49, %v1114_v37  ;;  %v2865_v1 = vor.u32 %v3568_v59, %v2862_v61  ;;  %2001 = vmatpush.bf16.msrb.mxu2 %v3245_v45  ;;  %v3105_v37 = vor.u32 %v3628_v33, %v3102_v34  ;;  %v3097_v49 = vor.u32 %v3626_v24, %v3094_v47  ;;  %v3624_v45 = vld [vmem:[%s5550_s3 + $0x1c4] sm:$0xf]  ;;  %v3166_v33 = vld [vmem:[%s5550_s3 + $0x268] sm:$0xf0]  ;;  %v3618_v34 = vld [vmem:[%s5550_s3 + $0x194] sm:$0xf] }
  0xdb   :  { %2041 = vmatpush.bf16.msra.mxu1 %v2945_v52  ;;  %v3606_v52 = vld [vmem:[%s5550_s3 + $0x134] sm:$0xf]  ;;  %v3616_v24 = vld [vmem:[%s5550_s3 + $0x184] sm:$0xf]  ;;  %v3054_v47 = vld [vmem:[%s5550_s3 + $0x188] sm:$0xf0] }
  0xdc   :  { %1946 = vmatmul.bf16.vlgmr.msra.gmra.mxu2 %v5117_v60  ;;  %v3728_v7 = vpop.eup %3727  ;;  %v3017_v58 = vor.u32 %v3606_v52, %v3014_v56  ;;  %v3057_v52 = vor.u32 %v3616_v24, %v3054_v47  ;;  %v3302_v24 = vld [vmem:[%s5550_s3 + $0x378] sm:$0xf0] }
  0xdd   :  { %2028 = vmatpush.bf16.msra.mxu0 %v2873_v46  ;;  %v2853_v10 = vadd.f32 -1.0, %v3728_v7  ;;  %v3622_v7 = vld [vmem:[%s5550_s3 + $0x1b4] sm:$0xf] }
  0xde   :  { %2050 = vmatpush.bf16.msra.mxu2 %v3049_v2  ;;  %v3006_v2 = vld [vmem:[%s5550_s3 + $0x128] sm:$0xf0] }
  0xdf   :  { %v1123_v57 = vsel %vm1059_vm7, %v5062_v51, %v2853_v10  ;;  %2042 = vmatpush.bf16.msra.mxu1 %v2937_v8  ;;  %v3630_v51 = vld [vmem:[%s5550_s3 + $0x1f4] sm:$0xf] }
  0xe0   :  { %v5166_v23 = vpack.c.bf16 %v1123_v57, %v1115_v9  ;;  %v3113_v28 = vor.u32 %v3630_v51, %v3110_v27  ;;  %v3081_v9 = vor.u32 %v3622_v7, %v3078_v42  ;;  %v3646_v10 = vld [vmem:[%s5550_s3 + $0x274] sm:$0xf]  ;;  %v3001_v57 = vor.u32 %v3602_v12, %v2998_v13  ;;  %v3222_v7 = vld [vmem:[%s5550_s3 + $0x2d8] sm:$0xf0] }
  0xe1   :  { %2029 = vmatpush.bf16.msra.mxu0 %v2865_v1  ;;  %v945_v14 = vpop.f32.mrf.mxu0  ;;  %v3604_v1 = vld [vmem:[%s5550_s3 + $0x124] sm:$0xf]  ;;  %v3177_v29 = vor.u32 %v3646_v10, %v3174_v16  ;;  %v3638_v10 = vld [vmem:[%s5550_s3 + $0x234] sm:$0xf]  ;;  %v3142_v12 = vld [vmem:[%s5550_s3 + $0x238] sm:$0xf0] }
  0xe2   :  { %v946_v17 = vadd.f32 %v945_v14, %v162_v0  ;;  %2051 = vmatpush.bf16.msra.mxu2 %v3041_v15  ;;  %1960 = vmatmul.bf16.vlgmr.msra.gmra.mxu3 %v5166_v23  ;;  %v3009_v5 = vor.u32 %v3604_v1, %v3006_v2  ;;  %v165_v1 = vperm.slane %v4680_v54, 7  ;;  %v3150_v2 = vld [vmem:[%s5550_s3 + $0x248] sm:$0xf0] }
  0xe3   :  { %v959_v18 = vpop.f32.mrf.mxu1  ;;  %2043 = vmatpush.bf16.msra.mxu1 %v2929_v26  ;;  %2064 = vmatpush.bf16.msra.mxu3 %v3113_v28  ;;  %v2990_v26 = vld [vmem:[%s5550_s3 + $0x108] sm:$0xf0] }
  0xe4   :  { %v5174_v55 = vadd.f32 %v959_v18, %v946_v17  ;;  %v3620_v18 = vld [vmem:[%s5550_s3 + $0x1a4] sm:$0xf] }
  0xe5   :  { %v3073_v21 = vor.u32 %v3620_v18, %v3070_v19  ;;  %v3656_v18 = vld [vmem:[%s5550_s3 + $0x2c4] sm:$0xf]  ;;  %v3214_v19 = vld [vmem:[%s5550_s3 + $0x2c8] sm:$0xf0] }
  0xe6   :  { %v1072_v35 = vmul.f32 1.442695, %v5174_v55  ;;  %2052 = vmatpush.bf16.msra.mxu2 %v3033_v32  ;;  %vm1052_vm8 = vcmp.gt.f32.partialorder %v5174_v55, 0.0 }
  0xe7   :  { %v973_v36 = vpop.f32.mrf.mxu2  ;;  %2065 = vmatpush.bf16.msra.mxu3 %v3105_v37 }
  0xe8   :  { %v974_v40 = vadd.f32 %v973_v36, %v163_v31  ;;  %3729 = vpow2.f32 %v1072_v35  ;;  %v164_v35 = vperm.slane %v4680_v54, 6  ;;  %v3658_v54 = vld [vmem:[%s5550_s3 + $0x2d4] sm:$0xf] }
  0xe9   :  { %v947_v41 = vpop.f32.mrf.mxu0  ;;  %v987_v43 = vpop.f32.mrf.mxu3  ;;  %v3225_v16 = vor.u32 %v3658_v54, %v3222_v7  ;;  %v3366_v54 = vld [vmem:[%s5550_s3 + $0x3f8] sm:$0xf0] }
  0xea   :  { %v948_v44 = vadd.f32 %v947_v41, %v162_v0  ;;  %v5203_v48 = vadd.f32 %v987_v43, %v974_v40  ;;  %2053 = vmatpush.bf16.msra.mxu2 %v3025_v22  ;;  %v3089_v0 = vor.u32 %v3624_v45, %v3086_v62  ;;  %v3169_v41 = vor.u32 %v3644_v30, %v3166_v33  ;;  %v3642_v43 = vld [vmem:[%s5550_s3 + $0x254] sm:$0xf]  ;;  %v3158_v22 = vld [vmem:[%s5550_s3 + $0x258] sm:$0xf0] }
  0xeb   :  { %v961_v46 = vpop.f32.mrf.mxu1  ;;  %2066 = vmatpush.bf16.msra.mxu3 %v3097_v49  ;;  %v3161_v62 = vor.u32 %v3642_v43, %v3158_v22  ;;  %v3206_v30 = vld [vmem:[%s5550_s3 + $0x2b8] sm:$0xf0]  ;;  %v3634_v33 = vld [vmem:[%s5550_s3 + $0x214] sm:$0xf]  ;;  %v3118_v22 = vld [vmem:[%s5550_s3 + $0x208] sm:$0xf0] }
  0xec   :  { %v962_v50 = vadd.f32 %v961_v46, %v948_v44  ;;  %v1074_v61 = vmul.f32 1.442695, %v5203_v48  ;;  %vm1053_vm10 = vcmp.gt.f32.partialorder %v5203_v48, 0.0 }
  0xee   :  { %v1088_v59 = vmul.f32 1.442695, %v962_v50  ;;  %2054 = vmatpush.bf16.msra.mxu2 %v3017_v58  ;;  %v3730_v6 = vpop.eup %3729  ;;  %vm1060_vm9 = vcmp.gt.f32.partialorder %v962_v50, 0.0 }
  0xef   :  { %v975_v63 = vpop.f32.mrf.mxu2  ;;  %2067 = vmatpush.bf16.msra.mxu3 %v3089_v0  ;;  %v2846_v14 = vadd.f32 -1.0, %v3730_v6  ;;  %v3230_v0 = vld [vmem:[%s5550_s3 + $0x2e8] sm:$0xf0] }
  0xf0   :  { %3731 = vpow2.f32 %v1088_v59  ;;  %v976_v3 = vadd.f32 %v975_v63, %v163_v31  ;;  %v2993_v31 = vor.u32 %v3600_v25, %v2990_v26  ;;  %v3241_v59 = vor.u32 %v3662_v38, %v3238_v39  ;;  %v3660_v63 = vld [vmem:[%s5550_s3 + $0x2e4] sm:$0xf]  ;;  %v3198_v39 = vld [vmem:[%s5550_s3 + $0x2a8] sm:$0xf0] }
  0xf1   :  { %v989_v4 = vpop.f32.mrf.mxu3  ;;  %3733 = vpow2.f32 %v1074_v61  ;;  %v1116_v27 = vsel %vm1052_vm8, %v5174_v55, %v2846_v14  ;;  %v3062_v55 = vld [vmem:[%s5550_s3 + $0x198] sm:$0xf0]  ;;  %v3652_v38 = vld [vmem:[%s5550_s3 + $0x2a4] sm:$0xf] }
  0xf2   :  { %v990_v8 = vadd.f32 %v989_v4, %v976_v3  ;;  %2055 = vmatpush.bf16.msra.mxu2 %v3009_v5  ;;  %v3065_v36 = vor.u32 %v3618_v34, %v3062_v55  ;;  %v3233_v3 = vor.u32 %v3660_v63, %v3230_v0  ;;  %v3676_v0 = vld [vmem:[%s5550_s3 + $0x364] sm:$0xf] }
  0xf3   :  { %2068 = vmatpush.bf16.msra.mxu3 %v3081_v9 }
  0xf4   :  { %v1090_v15 = vmul.f32 1.442695, %v990_v8  ;;  %vm1061_vm11 = vcmp.gt.f32.partialorder %v990_v8, 0.0 }
  0xf6   :  { %v3732_v17 = vpop.eup %3731  ;;  %3735 = vpow2.f32 %v1090_v15  ;;  %2056 = vmatpush.bf16.msra.mxu2 %v3001_v57 }
  0xf7   :  { %v2854_v20 = vadd.f32 -1.0, %v3732_v17  ;;  %v3734_v51 = vpop.eup %3733  ;;  %2069 = vmatpush.bf16.msra.mxu3 %v3073_v21  ;;  %v3145_v17 = vor.u32 %v3638_v10, %v3142_v12  ;;  %v3134_v21 = vld [vmem:[%s5550_s3 + $0x228] sm:$0xf0] }
  0xf8   :  { %v2847_v37 = vadd.f32 -1.0, %v3734_v51  ;;  %v3217_v51 = vor.u32 %v3656_v18, %v3214_v19 }
  0xf9   :  { %v1124_v28 = vsel %vm1060_vm9, %v962_v50, %v2854_v20  ;;  %v3636_v20 = vld [vmem:[%s5550_s3 + $0x224] sm:$0xf] }
  0xfa   :  { %v5259_v32 = vpack.c.bf16 %v1124_v28, %v1116_v27  ;;  %2057 = vmatpush.bf16.msra.mxu2 %v2993_v31  ;;  %v1117_v56 = vsel %vm1053_vm10, %v5203_v48, %v2847_v37  ;;  %v3640_v48 = vld [vmem:[%s5550_s3 + $0x244] sm:$0xf]  ;;  %v3137_v28 = vor.u32 %v3636_v20, %v3134_v21  ;;  %v3690_v20 = vld [vmem:[%s5550_s3 + $0x3d4] sm:$0xf]  ;;  %v3350_v21 = vld [vmem:[%s5550_s3 + $0x3d8] sm:$0xf0] }
  0xfb   :  { %2070 = vmatpush.bf16.msra.mxu3 %v3065_v36  ;;  %v3153_v6 = vor.u32 %v3640_v48, %v3150_v2 }
  0xfc   :  { %1974 = vmatmul.bf16.vlgmr.msrb.gmra.mxu0 %v5259_v32  ;;  %v3736_v40 = vpop.eup %3735 }
  0xfd   :  { %2078 = vmatpush.bf16.msrb.mxu0 %v3177_v29  ;;  %v2855_v44 = vadd.f32 -1.0, %v3736_v40  ;;  %v3654_v29 = vld [vmem:[%s5550_s3 + $0x2b4] sm:$0xf]  ;;  %v3632_v40 = vld [vmem:[%s5550_s3 + $0x204] sm:$0xf] }
  0xfe   :  { %v3209_v36 = vor.u32 %v3654_v29, %v3206_v30  ;;  %v3668_v29 = vld [vmem:[%s5550_s3 + $0x324] sm:$0xf]  ;;  %v3262_v30 = vld [vmem:[%s5550_s3 + $0x328] sm:$0xf0] }
  0xff   :  { %v1125_v58 = vsel %vm1061_vm11, %v990_v8, %v2855_v44  ;;  %2071 = vmatpush.bf16.msra.mxu3 %v3057_v52  ;;  %v3190_v52 = vld [vmem:[%s5550_s3 + $0x298] sm:$0xf0] }
 0x100   :  { %v5292_v45 = vpack.c.bf16 %v1125_v58, %v1117_v56 }
 0x101   :  { %v1001_v46 = vpop.f32.mrf.mxu0  ;;  %2079 = vmatpush.bf16.msrb.mxu0 %v3169_v41 }
 0x102   :  { %v1002_v49 = vadd.f32 %v1001_v46, %v164_v35  ;;  %1988 = vmatmul.bf16.vlgmr.msrb.gmra.mxu1 %v5292_v45  ;;  %v3678_v46 = vld [vmem:[%s5550_s3 + $0x374] sm:$0xf] }
 0x103   :  { %v1015_v50 = vpop.f32.mrf.mxu1  ;;  %2092 = vmatpush.bf16.msrb.mxu1 %v3241_v59 }
 0x104   :  { %v5294_v61 = vadd.f32 %v1015_v50, %v1002_v49  ;;  %v3201_v49 = vor.u32 %v3652_v38, %v3198_v39  ;;  %v3121_v50 = vor.u32 %v3632_v40, %v3118_v22  ;;  %v3326_v38 = vld [vmem:[%s5550_s3 + $0x3a8] sm:$0xf0]  ;;  %v3664_v39 = vld [vmem:[%s5550_s3 + $0x304] sm:$0xf]  ;;  %v3682_v22 = vld [vmem:[%s5550_s3 + $0x394] sm:$0xf] }
 0x105   :  { %2080 = vmatpush.bf16.msrb.mxu0 %v3161_v62  ;;  %v3305_v62 = vor.u32 %v3678_v46, %v3302_v24  ;;  %v3246_v40 = vld [vmem:[%s5550_s3 + $0x308] sm:$0xf0]  ;;  %v3680_v24 = vld [vmem:[%s5550_s3 + $0x384] sm:$0xf] }
 0x106   :  { %v1076_v4 = vmul.f32 1.442695, %v5294_v61  ;;  %vm1054_vm12 = vcmp.gt.f32.partialorder %v5294_v61, 0.0 }
 0x107   :  { %v1029_v5 = vpop.f32.mrf.mxu2  ;;  %2093 = vmatpush.bf16.msrb.mxu1 %v3233_v3  ;;  %v3182_v3 = vld [vmem:[%s5550_s3 + $0x288] sm:$0xf0] }
 0x108   :  { %v1030_v42 = vadd.f32 %v1029_v5, %v165_v1  ;;  %3737 = vpow2.f32 %v1076_v4 }
 0x109   :  { %v1043_v8 = vpop.f32.mrf.mxu3  ;;  %v1003_v9 = vpop.f32.mrf.mxu0  ;;  %2081 = vmatpush.bf16.msrb.mxu0 %v3153_v6  ;;  %v3694_v6 = vld [vmem:[%s5550_s3 + $0x3f4] sm:$0xf] }
 0x10a   :  { %v1004_v13 = vadd.f32 %v1003_v9, %v164_v35  ;;  %v5323_v14 = vadd.f32 %v1043_v8, %v1030_v42  ;;  %v3674_v42 = vld [vmem:[%s5550_s3 + $0x354] sm:$0xf]  ;;  %v3286_v8 = vld [vmem:[%s5550_s3 + $0x358] sm:$0xf0] }
 0x10b   :  { %v1017_v15 = vpop.f32.mrf.mxu1  ;;  %2094 = vmatpush.bf16.msrb.mxu1 %v3225_v16  ;;  %v3289_v16 = vor.u32 %v3674_v42, %v3286_v8  ;;  %v3696_v42 = vld [vmem:[%s5553_s5] sm:$0xff] }
 0x10c   :  { %v1018_v57 = vadd.f32 %v1017_v15, %v1004_v13  ;;  %v1078_v26 = vmul.f32 1.442695, %v5323_v14  ;;  %2030 = vmatmul.bf16.vlgmr.msra.gmra.mxu0 %v4893_v53  ;;  %v3126_v53 = vld [vmem:[%s5550_s3 + $0x218] sm:$0xf0]  ;;  %vm1055_vm14 = vcmp.gt.f32.partialorder %v5323_v14, 0.0  ;;  %v3369_v13 = vor.u32 %v3694_v6, %v3366_v54  ;;  %v3697_v6 = vld [vmem:[%s5553_s5 + $0x8] sm:$0xff] }
 0x10d   :  { %2082 = vmatpush.bf16.msrb.mxu0 %v3145_v17  ;;  %v3129_v37 = vor.u32 %v3634_v33, %v3126_v53  ;;  %v3358_v17 = vld [vmem:[%s5550_s3 + $0x3e8] sm:$0xf0]  ;;  %v3265_v33 = vor.u32 %v3668_v29, %v3262_v30  ;;  %v3686_v53 = vld [vmem:[%s5550_s3 + $0x3b4] sm:$0xf] }
 0x10e   :  { %v1092_v25 = vmul.f32 1.442695, %v1018_v57  ;;  %v3738_v34 = vpop.eup %3737  ;;  %vm1062_vm13 = vcmp.gt.f32.partialorder %v1018_v57, 0.0 }
 0x10f   :  { %v1031_v27 = vpop.f32.mrf.mxu2  ;;  %2095 = vmatpush.bf16.msrb.mxu1 %v3217_v51  ;;  %v2848_v41 = vadd.f32 -1.0, %v3738_v34  ;;  %v3353_v51 = vor.u32 %v3690_v20, %v3350_v21  ;;  %v3334_v34 = vld [vmem:[%s5550_s3 + $0x3b8] sm:$0xf0] }
 0x110   :  { %3739 = vpow2.f32 %v1092_v25  ;;  %v1032_v31 = vadd.f32 %v1031_v27, %v165_v1  ;;  %v3294_v1 = vld [vmem:[%s5550_s3 + $0x368] sm:$0xf0]  ;;  %v3670_v25 = vld [vmem:[%s5550_s3 + $0x334] sm:$0xf] }
 0x111   :  { %v1045_v55 = vpop.f32.mrf.mxu3  ;;  %3741 = vpow2.f32 %v1078_v26  ;;  %2083 = vmatpush.bf16.msrb.mxu0 %v3137_v28  ;;  %v1118_v58 = vsel %vm1054_vm12, %v5294_v61, %v2848_v41  ;;  %v3648_v61 = vld [vmem:[%s5550_s3 + $0x284] sm:$0xf]  ;;  %v3297_v5 = vor.u32 %v3676_v0, %v3294_v1  ;;  %v3270_v26 = vld [vmem:[%s5550_s3 + $0x338] sm:$0xf0]  ;;  %v5502_v0 = vld [vmem:[%s5554_s4] sm:$0x3] }
 0x112   :  { %v1046_v35 = vadd.f32 %v1045_v55, %v1032_v31  ;;  %2044 = vmatmul.bf16.vlgmr.msra.gmra.mxu1 %v4932_v11  ;;  %v3650_v11 = vld [vmem:[%s5550_s3 + $0x294] sm:$0xf]  ;;  %v3185_v9 = vor.u32 %v3648_v61, %v3182_v3  ;;  %v3273_v27 = vor.u32 %v3670_v25, %v3270_v26  ;;  %v3688_v28 = vld [vmem:[%s5550_s3 + $0x3c4] sm:$0xf] }
 0x113   :  { %2096 = vmatpush.bf16.msrb.mxu1 %v3209_v36  ;;  %v3193_v48 = vor.u32 %v3650_v11, %v3190_v52  ;;  %v3666_v55 = vld [vmem:[%s5550_s3 + $0x314] sm:$0xf] }
 0x114   :  { %v1094_v43 = vmul.f32 1.442695, %v1046_v35  ;;  %vm1063_vm15 = vcmp.gt.f32.partialorder %v1046_v35, 0.0  ;;  %v3702_v11 = vld [vmem:[%s5553_s5 + $0x30] sm:$0xff] }
 0x115   :  { %2084 = vmatpush.bf16.msrb.mxu0 %v3129_v37  ;;  %v3684_v37 = vld [vmem:[%s5550_s3 + $0x3a4] sm:$0xf] }
 0x116   :  { %v3740_v44 = vpop.eup %3739  ;;  %3743 = vpow2.f32 %v1094_v43  ;;  %v3329_v41 = vor.u32 %v3684_v37, %v3326_v38  ;;  %v3249_v43 = vor.u32 %v3664_v39, %v3246_v40  ;;  %v3706_v39 = vld [vmem:[%s5553_s5 + $0x50] sm:$0xff] }
 0x117   :  { %v2856_v47 = vadd.f32 -1.0, %v3740_v44  ;;  %v3742_v56 = vpop.eup %3741  ;;  %2097 = vmatpush.bf16.msrb.mxu1 %v3201_v49  ;;  %v3318_v44 = vld [vmem:[%s5550_s3 + $0x398] sm:$0xf0] }
 0x118   :  { %v2849_v2 = vadd.f32 -1.0, %v3742_v56  ;;  %v3321_v46 = vor.u32 %v3682_v22, %v3318_v44  ;;  %v3703_v49 = vld [vmem:[%s5553_s5 + $0x38] sm:$0xff]  ;;  %v3701_v56 = vld [vmem:[%s5553_s5 + $0x28] sm:$0xff] }
 0x119   :  { %v1126_v59 = vsel %vm1062_vm13, %v1018_v57, %v2856_v47  ;;  %2085 = vmatpush.bf16.msrb.mxu0 %v3121_v50  ;;  %v3692_v57 = vld [vmem:[%s5550_s3 + $0x3e4] sm:$0xf] }
 0x11a   :  { %v5378_v63 = vpack.c.bf16 %v1126_v59, %v1118_v58  ;;  %v1119_v10 = vsel %vm1055_vm14, %v5323_v14, %v2849_v2  ;;  %v3278_v14 = vld [vmem:[%s5550_s3 + $0x348] sm:$0xf0]  ;;  %v3361_v18 = vor.u32 %v3692_v57, %v3358_v17  ;;  %v3700_v58 = vld [vmem:[%s5553_s5 + $0x20] sm:$0xff]  ;;  %v3698_v2 = vld [vmem:[%s5553_s5 + $0x10] sm:$0xff] }
 0x11b   :  { %2098 = vmatpush.bf16.msrb.mxu1 %v3193_v48  ;;  %v1266_v48 = vperm.slane %v5502_v0, 0  ;;  %v3710_v17 = vld [vmem:[%s5553_s5 + $0x70] sm:$0xff] }
 0x11c   :  { %2002 = vmatmul.bf16.vlgmr.msrb.gmra.mxu2 %v5378_v63  ;;  %v3744_v4 = vpop.eup %3743  ;;  %2086 = vmatmul.bf16.vlgmr.msrb.gmra.mxu0 %v5259_v32  ;;  %v3672_v32 = vld [vmem:[%s5550_s3 + $0x344] sm:$0xf] }
 0x11d   :  { %2106 = vmatpush.bf16.msrb.mxu2 %v3305_v62  ;;  %v2857_v7 = vadd.f32 -1.0, %v3744_v4  ;;  %v3281_v19 = vor.u32 %v3672_v32, %v3278_v14  ;;  %2288 = vmatpush.bf16.msra.mxu0 %v3703_v49 }
 0x11f   :  { %v1127_v12 = vsel %vm1063_vm15, %v1046_v35, %v2857_v7  ;;  %2099 = vmatpush.bf16.msrb.mxu1 %v3185_v9  ;;  %v3254_v35 = vld [vmem:[%s5550_s3 + $0x318] sm:$0xf0] }
 0x120   :  { %v1135_v15 = vpack.c.bf16 %v1127_v12, %v1119_v10  ;;  %v3257_v36 = vor.u32 %v3666_v55, %v3254_v35 }
 0x121   :  { %2107 = vmatpush.bf16.msrb.mxu2 %v3297_v5  ;;  %2289 = vmatpush.bf16.msra.mxu0 %v3702_v11 }
 0x122   :  { %2016 = vmatmul.bf16.vlgmr.msrb.gmra.mxu3 %v1135_v15  ;;  %2100 = vmatmul.bf16.vlgmr.msrb.gmra.mxu1 %v5292_v45  ;;  %v3342_v45 = vld [vmem:[%s5550_s3 + $0x3c8] sm:$0xf0] }
 0x123   :  { %2120 = vmatpush.bf16.msrb.mxu3 %v3369_v13  ;;  %v3345_v31 = vor.u32 %v3688_v28, %v3342_v45 }
 0x125   :  { %2108 = vmatpush.bf16.msrb.mxu2 %v3289_v16  ;;  %2290 = vmatpush.bf16.msra.mxu0 %v3701_v56  ;;  %v3711_v16 = vld [vmem:[%s5553_s5 + $0x78] sm:$0xff] }
 0x126   :  { %2302 = vmatpush.bf16.msra.mxu1 %v3711_v16 }
 0x127   :  { %2121 = vmatpush.bf16.msrb.mxu3 %v3361_v18 }
 0x129   :  { %2109 = vmatpush.bf16.msrb.mxu2 %v3281_v19  ;;  %2291 = vmatpush.bf16.msra.mxu0 %v3700_v58 }
 0x12a   :  { %2303 = vmatpush.bf16.msra.mxu1 %v3710_v17 }
 0x12b   :  { %2122 = vmatpush.bf16.msrb.mxu3 %v3353_v51 }
 0x12c   :  { %2058 = vmatmul.bf16.vlgmr.msra.gmra.mxu2 %v5117_v60  ;;  %v3337_v60 = vor.u32 %v3686_v53, %v3334_v34 }
 0x12d   :  { %2110 = vmatpush.bf16.msrb.mxu2 %v3273_v27  ;;  %v3709_v27 = vld [vmem:[%s5553_s5 + $0x68] sm:$0xff] }
 0x12e   :  { %2304 = vmatpush.bf16.msra.mxu1 %v3709_v27 }
 0x12f   :  { %2123 = vmatpush.bf16.msrb.mxu3 %v3345_v31  ;;  %v3708_v31 = vld [vmem:[%s5553_s5 + $0x60] sm:$0xff] }
 0x131   :  { %2111 = vmatpush.bf16.msrb.mxu2 %v3265_v33 }
 0x132   :  { %2072 = vmatmul.bf16.vlgmr.msra.gmra.mxu3 %v5166_v23  ;;  %v3310_v23 = vld [vmem:[%s5550_s3 + $0x388] sm:$0xf0]  ;;  %2305 = vmatpush.bf16.msra.mxu1 %v3708_v31 }
 0x133   :  { %2124 = vmatpush.bf16.msrb.mxu3 %v3337_v60  ;;  %v3313_v47 = vor.u32 %v3680_v24, %v3310_v23  ;;  %v3707_v60 = vld [vmem:[%s5553_s5 + $0x58] sm:$0xff]  ;;  %v3705_v24 = vld [vmem:[%s5553_s5 + $0x48] sm:$0xff] }
 0x135   :  { %2112 = vmatpush.bf16.msrb.mxu2 %v3257_v36  ;;  %v1267_v36 = vperm.slane %v5502_v0, 1 }
 0x136   :  { %2306 = vmatpush.bf16.msra.mxu1 %v3707_v60 }
 0x137   :  { %2125 = vmatpush.bf16.msrb.mxu3 %v3329_v41 }
 0x139   :  { %2113 = vmatpush.bf16.msrb.mxu2 %v3249_v43  ;;  %v1919_v50 = vpop.f32.mrf.mxu0 }
 0x13a   :  { %v1920_v4 = vadd.f32 %v1919_v50, %v1266_v48  ;;  %2307 = vmatpush.bf16.msra.mxu1 %v3706_v39 }
 0x13b   :  { %2126 = vmatpush.bf16.msrb.mxu3 %v3321_v46 }
 0x13c   :  { %2114 = vmatmul.bf16.vlgmr.msrb.gmra.mxu2 %v5378_v63  ;;  %v3699_v63 = vld [vmem:[%s5553_s5 + $0x18] sm:$0xff] }
 0x13d   :  { %2292 = vmatpush.bf16.msra.mxu0 %v3699_v63 }
 0x13e   :  { %2308 = vmatpush.bf16.msra.mxu1 %v3705_v24 }
 0x13f   :  { %2127 = vmatpush.bf16.msrb.mxu3 %v3313_v47  ;;  %v1933_v52 = vpop.f32.mrf.mxu1 }
 0x140   :  { %v1934_v7 = vadd.f32 %v1933_v52, %v1920_v4  ;;  %v3704_v52 = vld [vmem:[%s5553_s5 + $0x40] sm:$0xff] }
 0x141   :  { %v1921_v59 = vpop.f32.mrf.mxu0  ;;  %2293 = vmatpush.bf16.msra.mxu0 %v3698_v2 }
 0x142   :  { %2128 = vmatmul.bf16.vlgmr.msrb.gmra.mxu3 %v1135_v15  ;;  %v1922_v12 = vadd.f32 %v1921_v59, %v1266_v48  ;;  %2309 = vmatpush.bf16.msra.mxu1 %v3704_v52 }
 0x145   :  { %2294 = vmatpush.bf16.msra.mxu0 %v3697_v6 }
 0x147   :  { %v1935_v1 = vpop.f32.mrf.mxu1 }
 0x148   :  { %v1936_v14 = vadd.f32 %v1935_v1, %v1922_v12 }
 0x149   :  { %2295 = vmatpush.bf16.msra.mxu0 %v3696_v42 }
 0x15f   :  { %v1947_v62 = vpop.f32.mrf.mxu2 }
 0x160   :  { %v1948_v8 = vadd.f32 %v1947_v62, %v1934_v7 }
 0x165   :  { %v1961_v61 = vpop.f32.mrf.mxu3 }
 0x166   :  { %v1962_v13 = vadd.f32 %v1961_v61, %v1948_v8 }
 0x167   :  { %v1949_v5 = vpop.f32.mrf.mxu2 }
 0x168   :  { %v1950_v19 = vadd.f32 %v1949_v5, %v1936_v14 }
 0x16d   :  { %v1963_v9 = vpop.f32.mrf.mxu3 }
 0x16e   :  { %v1964_v25 = vadd.f32 %v1963_v9, %v1950_v19 }
 0x179   :  { %v1975_v3 = vpop.f32.mrf.mxu0 }
 0x17a   :  { %v1976_v57 = vadd.f32 %v1975_v3, %v1962_v13 }
 0x17f   :  { %v1989_v54 = vpop.f32.mrf.mxu1 }
 0x180   :  { %v1990_v18 = vadd.f32 %v1989_v54, %v1976_v57 }
 0x181   :  { %v1977_v10 = vpop.f32.mrf.mxu0 }
 0x182   :  { %v1978_v45 = vadd.f32 %v1977_v10, %v1964_v25 }
 0x187   :  { %v1991_v32 = vpop.f32.mrf.mxu1 }
 0x188   :  { %v1992_v29 = vadd.f32 %v1991_v32, %v1978_v45 }
 0x189   :  { %v2031_v28 = vpop.f32.mrf.mxu0 }
 0x18a   :  { %v2032_v41 = vadd.f32 %v2031_v28, %v1267_v36 }
 0x18f   :  { %v2045_v33 = vpop.f32.mrf.mxu1 }
 0x190   :  { %v2046_v44 = vadd.f32 %v2045_v33, %v2032_v41 }
 0x191   :  { %v2033_v38 = vpop.f32.mrf.mxu0 }
 0x192   :  { %v2034_v62 = vadd.f32 %v2033_v38, %v1267_v36 }
 0x197   :  { %v2047_v43 = vpop.f32.mrf.mxu1 }
 0x198   :  { %v2048_v1 = vadd.f32 %v2047_v43, %v2034_v62 }
 0x199   :  { %v2087_v56 = vpop.f32.mrf.mxu0 }
 0x19f   :  { %v2003_v15 = vpop.f32.mrf.mxu2  ;;  %v2101_v2 = vpop.f32.mrf.mxu1 }
 0x1a0   :  { %v2004_v20 = vadd.f32 %v2003_v15, %v1990_v18 }
 0x1a1   :  { %v2089_v54 = vpop.f32.mrf.mxu0 }
 0x1a5   :  { %v2017_v21 = vpop.f32.mrf.mxu3 }
 0x1a6   :  { %v2018_v26 = vadd.f32 %v2017_v21, %v2004_v20 }
 0x1a7   :  { %v2005_v51 = vpop.f32.mrf.mxu2  ;;  %v2103_v9 = vpop.f32.mrf.mxu1 }
 0x1a8   :  { %v2138_v30 = vmul.f32 1.442695, %v2018_v26  ;;  %v2006_v53 = vadd.f32 %v2005_v51, %v1992_v29  ;;  %vm2134_vm0 = vcmp.gt.f32.partialorder %v2018_v26, 0.0  ;;  %v3712_v51 = vld [vmem:[%s5552_s6] ss:$0 sm:$0xff] }
 0x1aa   :  { %3745 = vpow2.f32 %v2138_v30 }
 0x1ad   :  { %v2019_v34 = vpop.f32.mrf.mxu3 }
 0x1ae   :  { %v2020_v55 = vadd.f32 %v2019_v34, %v2006_v53 }
 0x1af   :  { %v2059_v35 = vpop.f32.mrf.mxu2 }
 0x1b0   :  { %v2142_v37 = vmul.f32 1.442695, %v2020_v55  ;;  %v3746_v40 = vpop.eup %3745  ;;  %v2060_v49 = vadd.f32 %v2059_v35, %v2046_v44  ;;  %vm2136_vm1 = vcmp.gt.f32.partialorder %v2020_v55, 0.0 }
 0x1b1   :  { %v3370_v23 = vadd.f32 -1.0, %v3746_v40 }
 0x1b2   :  { %3747 = vpow2.f32 %v2142_v37 }
 0x1b3   :  { %v2150_v58 = vsel %vm2134_vm0, %v2018_v26, %v3370_v23 }
 0x1b5   :  { %v2073_v22 = vpop.f32.mrf.mxu3 }
 0x1b6   :  { %v2074_v11 = vadd.f32 %v2073_v22, %v2060_v49 }
 0x1b7   :  { %v2061_v46 = vpop.f32.mrf.mxu2 }
 0x1b8   :  { %v3748_v47 = vpop.eup %3747  ;;  %v2088_v48 = vadd.f32 %v2087_v56, %v2074_v11  ;;  %v2062_v3 = vadd.f32 %v2061_v46, %v2048_v1 }
 0x1b9   :  { %v3372_v50 = vadd.f32 -1.0, %v3748_v47 }
 0x1ba   :  { %v2102_v5 = vadd.f32 %v2101_v2, %v2088_v48 }
 0x1bb   :  { %v2152_v59 = vsel %vm2136_vm1, %v2020_v55, %v3372_v50 }
 0x1bc   :  { %v2154_v63 = vpack.c.bf16 %v2152_v59, %v2150_v58 }
 0x1bd   :  { %v2075_v0 = vpop.f32.mrf.mxu3 }
 0x1be   :  { %2296 = vmatmul.bf16.vlgmr.msra.gmra.mxu0 %v2154_v63  ;;  %v2076_v4 = vadd.f32 %v2075_v0, %v2062_v3 }
 0x1bf   :  { %v2115_v61 = vpop.f32.mrf.mxu2 }
 0x1c0   :  { %v2116_v6 = vadd.f32 %v2115_v61, %v2102_v5  ;;  %v2090_v42 = vadd.f32 %v2089_v54, %v2076_v4 }
 0x1c2   :  { %v2104_v13 = vadd.f32 %v2103_v9, %v2090_v42 }
 0x1c5   :  { %v2129_v7 = vpop.f32.mrf.mxu3 }
 0x1c6   :  { %v2130_v8 = vadd.f32 %v2129_v7, %v2116_v6 }
 0x1c7   :  { %v2117_v10 = vpop.f32.mrf.mxu2 }
 0x1c8   :  { %v2140_v12 = vmul.f32 1.442695, %v2130_v8  ;;  %v2118_v15 = vadd.f32 %v2117_v10, %v2104_v13  ;;  %vm2135_vm2 = vcmp.gt.f32.partialorder %v2130_v8, 0.0 }
 0x1ca   :  { %3749 = vpow2.f32 %v2140_v12 }
 0x1cd   :  { %v2131_v16 = vpop.f32.mrf.mxu3 }
 0x1ce   :  { %v2132_v57 = vadd.f32 %v2131_v16, %v2118_v15 }
 0x1d0   :  { %v2144_v17 = vmul.f32 1.442695, %v2132_v57  ;;  %v3750_v32 = vpop.eup %3749  ;;  %vm2137_vm3 = vcmp.gt.f32.partialorder %v2132_v57, 0.0 }
 0x1d1   :  { %v3371_v14 = vadd.f32 -1.0, %v3750_v32 }
 0x1d2   :  { %3751 = vpow2.f32 %v2144_v17 }
 0x1d3   :  { %v2151_v20 = vsel %vm2135_vm2, %v2130_v8, %v3371_v14 }
 0x1d8   :  { %v3752_v18 = vpop.eup %3751 }
 0x1d9   :  { %v3373_v19 = vadd.f32 -1.0, %v3752_v18 }
 0x1db   :  { %v2153_v21 = vsel %vm2137_vm3, %v2132_v57, %v3373_v19 }
 0x1dc   :  { %v2155_v25 = vpack.c.bf16 %v2153_v21, %v2151_v20 }
 0x1de   :  { %2310 = vmatmul.bf16.vlgmr.msra.gmra.mxu1 %v2155_v25 }
 0x23b   :  { %v2297_v26 = vpop.f32.mrf.mxu0 }
 0x23c   :  { %v2298_v27 = vadd.f32 %v3712_v51, %v2297_v26 }
 0x243   :  { %v2299_v29 = vpop.f32.mrf.mxu0 }
 0x244   :  { %v2300_v30 = vadd.f32 %v3712_v51, %v2299_v29 }
 0x25b   :  { %v2311_v28 = vpop.f32.mrf.mxu1 }
 0x25c   :  { %v2312_v45 = vadd.f32 %v2311_v28, %v2298_v27 }
 0x25e   :  { %2316 = vst [vmem:[%s5555_s7] sm:$0xff] %v2312_v45 }
 0x263   :  { %v2313_v31 = vpop.f32.mrf.mxu1 }
 0x264   :  { %v2314_v33 = vadd.f32 %v2313_v31, %v2300_v30 }
 0x266   :  { %2317 = vst [vmem:[%s5555_s7 + $0x8] sm:$0xff] %v2314_v33 }

</bundles_post_ra>
